<compile_context>
chip_gen: v7x
topology: tpu7x:2x2x1
jax: 0.10.0
libtpu: 0.0.40
codegen_flags: <defaults>
</compile_context>

<pallas_src>
import functools

import jax
import jax.numpy as jnp
from jax.experimental import pallas as pl
from jax.experimental.pallas import tpu as pltpu

LANE = 128    # lane width / output-channel & K padding granularity
MAX_TM = 512  # max M-tile for the im2col matmul
SUBL = 16     # M-tile granularity (bf16 packed sublane tile)


def _round_up(x, m):
    return ((x + m - 1) // m) * m


# ---------------------------------------------------------------------------
# Pallas kernel: one M-tile of  (X @ W + b) -> LeakyReLU(0.2)
#   X tile: (TM, Kp) bf16, W: (Kp, Np) bf16, b: (1, Np) f32,
#   out: (TM, Np) in o_ref.dtype (bf16 for hidden layers, f32 for the last).
# ---------------------------------------------------------------------------
def _convmm_lrelu_kernel(x_ref, w_ref, b_ref, o_ref):
    acc = jnp.dot(x_ref[...], w_ref[...], preferred_element_type=jnp.float32)
    acc = acc + b_ref[...]
    act = jnp.where(acc >= 0, acc, 0.2 * acc)
    o_ref[...] = act.astype(o_ref.dtype)


# ---------------------------------------------------------------------------
# im2col in NHWC (column order = (kh, kw, C)), done in bf16 to cut HBM traffic.
# ---------------------------------------------------------------------------
def _im2col_nhwc(x, kh, kw, stride, pad):
    """x: (N, H, W, C) -> (N*Ho*Wo, kh*kw*C) bf16."""
    n, h, w, c = x.shape
    # TODO(synk): zero padding assumed (Conv2dLayer default pad_type='zero');
    # reflection pad would need jnp.pad(..., mode="reflect") here.
    xp = jnp.pad(x.astype(jnp.bfloat16), ((0, 0), (pad, pad), (pad, pad), (0, 0)))
    ho = (h + 2 * pad - kh) // stride + 1
    wo = (w + 2 * pad - kw) // stride + 1
    patches = []
    for i in range(kh):
        for j in range(kw):
            patches.append(
                xp[:, i : i + stride * ho : stride, j : j + stride * wo : stride, :]
            )  # (N, Ho, Wo, C)
    col = jnp.concatenate(patches, axis=-1)        # (N, Ho, Wo, kh*kw*C)
    col = col.reshape(n * ho * wo, kh * kw * c)
    return col, ho, wo


# ---------------------------------------------------------------------------
# Conv2d (PyTorch OIHW weight) + bias + LeakyReLU(0.2), NHWC in / NHWC out
# ---------------------------------------------------------------------------
def conv2d_lrelu_nhwc(x, weight, bias, stride, pad, out_dtype=jnp.bfloat16):
    n = x.shape[0]
    cout, cin, kh, kw = weight.shape
    assert x.shape[-1] == cin

    cols, ho, wo = _im2col_nhwc(x, kh, kw, stride, pad)
    m, k = cols.shape

    # MXU / lane friendly padding: K and Cout up to 128 multiples, M-tile per layer.
    k_pad = _round_up(k, LANE)
    n_pad = _round_up(cout, LANE)
    tm = min(MAX_TM, _round_up(m, SUBL))
    m_pad = _round_up(m, tm)

    cols = jnp.pad(cols, ((0, m_pad - m), (0, k_pad - k)))  # already bf16

    # (Cout, Cin, kh, kw) -> (kh, kw, Cin, Cout) to match im2col column order.
    w_mat = weight.transpose(2, 3, 1, 0).reshape(k, cout)
    w_mat = jnp.pad(w_mat, ((0, k_pad - k), (0, n_pad - cout))).astype(jnp.bfloat16)
    b_mat = jnp.pad(bias, (0, n_pad - cout)).reshape(1, n_pad).astype(jnp.float32)

    out_bytes = jnp.dtype(out_dtype).itemsize

    # Advisory cost model for XLA scheduling around the custom call.
    cost = pl.CostEstimate(
        flops=2 * m_pad * k_pad * n_pad,
        transcendentals=0,
        bytes_accessed=(
            m_pad * k_pad * 2 + k_pad * n_pad * 2 + n_pad * 4
            + m_pad * n_pad * out_bytes
        ),
    )

    # Working set: double-buffered bf16 X tiles + resident bf16 W + bias row +
    # double-buffered output tiles; generous headroom, capped well below
    # v7x's 64 MiB physical VMEM.
    vmem_need = (
        2 * tm * k_pad * 2          # X tiles (double-buffered, bf16)
        + k_pad * n_pad * 2         # weight (resident, bf16)
        + n_pad * 4                 # bias row
        + 2 * tm * n_pad * out_bytes  # output tiles (double-buffered)
    )
    vmem_limit = int(min(max(4 * vmem_need, 4 << 20), 48 << 20))

    out = pl.pallas_call(
        _convmm_lrelu_kernel,
        out_shape=jax.ShapeDtypeStruct((m_pad, n_pad), out_dtype),
        grid=(m_pad // tm,),
        in_specs=[
            pl.BlockSpec((tm, k_pad), lambda i: (i, 0)),      # X tile
            pl.BlockSpec((k_pad, n_pad), lambda i: (0, 0)),   # full (padded) weight
            pl.BlockSpec((1, n_pad), lambda i: (0, 0)),       # bias row
        ],
        out_specs=pl.BlockSpec((tm, n_pad), lambda i: (i, 0)),
        compiler_params=pltpu.CompilerParams(
            dimension_semantics=("parallel",),
            vmem_limit_bytes=vmem_limit,
        ),
        cost_estimate=cost,
    )(cols, w_mat, b_mat)

    out = out[:m, :cout].reshape(n, ho, wo, cout)  # stay NHWC
    return out


# ---------------------------------------------------------------------------
# Parameter construction (deterministic, synthetic) + forward
# ---------------------------------------------------------------------------
def init_params(key, in_channel=3, latent_channel=8):
    lc = latent_channel
    # (cout, cin, k, stride, pad) for each block of PatchDiscriminator1
    cfgs = [
        (lc,     in_channel, 7, 1, 3),
        (lc * 2, lc,         4, 2, 1),
        (lc * 4, lc * 2,     4, 2, 1),
        (lc * 4, lc * 4,     4, 2, 1),
        (lc * 4, lc * 4,     4, 2, 1),
        (lc * 4, lc * 4,     4, 2, 1),
    ]
    params = []
    for cout, cin, k, stride, pad in cfgs:
        key, kw_key, kb_key = jax.random.split(key, 3)
        fan_in = cin * k * k
        scale = 1.0 / jnp.sqrt(jnp.float32(fan_in))
        w = jax.random.normal(kw_key, (cout, cin, k, k), jnp.float32) * scale
        b = jax.random.normal(kb_key, (cout,), jnp.float32) * 0.01
        # TODO(synk): spectral normalization (power iteration on w) is skipped;
        # weights are synthetic so SN would only be a deterministic rescale.
        params.append((w, b, stride, pad))
    return params


def patch_discriminator1_forward(params, img):
    x = jnp.transpose(img, (0, 2, 3, 1))  # NCHW -> NHWC once at the boundary
    n_layers = len(params)
    for li, (w, b, stride, pad) in enumerate(params):
        # Hidden layers store bf16 (identical downstream values, half the HBM
        # traffic); final layer emits f32 for the flattened features.
        out_dtype = jnp.float32 if li == n_layers - 1 else jnp.bfloat16
        x = conv2d_lrelu_nhwc(x, w, b, stride, pad, out_dtype=out_dtype)
    x = jnp.transpose(x, (0, 3, 1, 2))    # back to NCHW so Flatten matches PyTorch
    n = x.shape[0]
    return x.reshape(n, -1)


# ---------------------------------------------------------------------------
if __name__ == "__main__":
    key = jax.random.PRNGKey(0)
    pkey, xkey = jax.random.split(key)

    in_channel = 3
    latent_channel = 8          # small synthetic width (module default is 64)
    n, h, w = 2, 32, 32         # 5 stride-2 convs -> final spatial 1x1

    params = init_params(pkey, in_channel, latent_channel)
    img = jax.random.normal(xkey, (n, in_channel, h, w), jnp.float32)

    fwd = jax.jit(functools.partial(patch_discriminator1_forward, params))
    out = fwd(img)
    out = jax.block_until_ready(out)

    expected_feat = latent_channel * 4 * 1 * 1
    assert out.shape == (n, expected_feat), out.shape
    assert out.dtype == jnp.float32
    assert jnp.all(jnp.isfinite(out))
    print("KERNEL_OK")
</pallas_src>

<mosaic_0001>
module attributes {stable_mosaic.version = 11 : i64} {
  func.func @_convmm_lrelu_kernel(%arg0: i32, %arg1: memref<512x256xbf16, #tpu.memory_space<vmem>>, %arg2: memref<256x128xbf16, #tpu.memory_space<vmem>>, %arg3: memref<1x128xf32, #tpu.memory_space<vmem>>, %arg4: memref<512x128xbf16, #tpu.memory_space<vmem>>) attributes {dimension_semantics = [#tpu.dimension_semantics<parallel>], iteration_bounds = array<i64: 4>, scalar_prefetch = 0 : i64, scratch_operands = 0 : i64, tpu.core_type = #tpu.core_type<tc>, window_params = [{transform_indices = @transform_0, window_bounds = array<i64: 512, 256>}, {pipeline_mode = #tpu.pipeline_mode<synchronous>, transform_indices = @transform_1, window_bounds = array<i64: 256, 128>}, {pipeline_mode = #tpu.pipeline_mode<synchronous>, transform_indices = @transform_2, window_bounds = array<i64: 1, 128>}, {transform_indices = @transform_3, window_bounds = array<i64: 512, 128>}]} {
    %c0 = arith.constant 0 : index
    %c0_0 = arith.constant 0 : index
    %0 = vector.load %arg1[%c0, %c0_0] : memref<512x256xbf16, #tpu.memory_space<vmem>>, vector<512x256xbf16>
    %c0_1 = arith.constant 0 : index
    %c0_2 = arith.constant 0 : index
    %1 = vector.load %arg2[%c0_1, %c0_2] : memref<256x128xbf16, #tpu.memory_space<vmem>>, vector<256x128xbf16>
    %cst = arith.constant dense<0.000000e+00> : vector<512x128xf32>
    %2 = tpu.matmul %0, %1, %cst {dimension_numbers = #tpu.dot_dimension_numbers<[1], [0], [0], [1], [0, 0, 1, 1], [], []>} : vector<512x256xbf16>, vector<256x128xbf16>, vector<512x128xf32> -> vector<512x128xf32>
    %c0_3 = arith.constant 0 : index
    %c0_4 = arith.constant 0 : index
    %3 = vector.load %arg3[%c0_3, %c0_4] : memref<1x128xf32, #tpu.memory_space<vmem>>, vector<1x128xf32>
    %4 = vector.broadcast %3 : vector<1x128xf32> to vector<512x128xf32>
    %5 = arith.addf %2, %4 : vector<512x128xf32>
    %cst_5 = arith.constant 0.000000e+00 : f32
    %6 = vector.broadcast %cst_5 : f32 to vector<512x128xf32>
    %7 = arith.cmpf oge, %5, %6 : vector<512x128xf32>
    %cst_6 = arith.constant 2.000000e-01 : f32
    %8 = vector.broadcast %cst_6 : f32 to vector<512x128xf32>
    %9 = arith.mulf %8, %5 : vector<512x128xf32>
    %10 = arith.select %7, %5, %9 : vector<512x128xi1>, vector<512x128xf32>
    %11 = arith.truncf %10 : vector<512x128xf32> to vector<512x128xbf16>
    %c0_7 = arith.constant 0 : index
    %c0_8 = arith.constant 0 : index
    %12 = vector.load %arg4[%c0_7, %c0_8] : memref<512x128xbf16, #tpu.memory_space<vmem>>, vector<512x128xbf16>
    tpu.vector_store %arg4[%c0_7, %c0_8], %11 {strides = array<i32>} : memref<512x128xbf16, #tpu.memory_space<vmem>>, vector<512x128xbf16>,
    return
  }
  func.func @transform_0(%arg0: i32) -> (i32, i32) {
    %c0_i32 = arith.constant 0 : i32
    %c0_i32_0 = arith.constant 0 : i32
    return %arg0, %c0_i32 : i32, i32
  }
  func.func @transform_1(%arg0: i32) -> (i32, i32) {
    %c0_i32 = arith.constant 0 : i32
    %c0_i32_0 = arith.constant 0 : i32
    %c0_i32_1 = arith.constant 0 : i32
    return %c0_i32, %c0_i32_0 : i32, i32
  }
  func.func @transform_2(%arg0: i32) -> (i32, i32) {
    %c0_i32 = arith.constant 0 : i32
    %c0_i32_0 = arith.constant 0 : i32
    %c0_i32_1 = arith.constant 0 : i32
    return %c0_i32, %c0_i32_0 : i32, i32
  }
  func.func @transform_3(%arg0: i32) -> (i32, i32) {
    %c0_i32 = arith.constant 0 : i32
    %c0_i32_0 = arith.constant 0 : i32
    return %arg0, %c0_i32 : i32, i32
  }
}

module attributes {stable_mosaic.version = 11 : i64} {
  func.func @_convmm_lrelu_kernel(%arg0: i32, %arg1: memref<512x128xbf16, #tpu.memory_space<vmem>>, %arg2: memref<128x128xbf16, #tpu.memory_space<vmem>>, %arg3: memref<1x128xf32, #tpu.memory_space<vmem>>, %arg4: memref<512x128xbf16, #tpu.memory_space<vmem>>) attributes {dimension_semantics = [#tpu.dimension_semantics<parallel>], iteration_bounds = array<i64: 1>, scalar_prefetch = 0 : i64, scratch_operands = 0 : i64, tpu.core_type = #tpu.core_type<tc>, window_params = [{transform_indices = @transform_0, window_bounds = array<i64: 512, 128>}, {pipeline_mode = #tpu.pipeline_mode<synchronous>, transform_indices = @transform_1, window_bounds = array<i64: 128, 128>}, {pipeline_mode = #tpu.pipeline_mode<synchronous>, transform_indices = @transform_2, window_bounds = array<i64: 1, 128>}, {transform_indices = @transform_3, window_bounds = array<i64: 512, 128>}]} {
    %c0 = arith.constant 0 : index
    %c0_0 = arith.constant 0 : index
    %0 = vector.load %arg1[%c0, %c0_0] : memref<512x128xbf16, #tpu.memory_space<vmem>>, vector<512x128xbf16>
    %c0_1 = arith.constant 0 : index
    %c0_2 = arith.constant 0 : index
    %1 = vector.load %arg2[%c0_1, %c0_2] : memref<128x128xbf16, #tpu.memory_space<vmem>>, vector<128x128xbf16>
    %cst = arith.constant dense<0.000000e+00> : vector<512x128xf32>
    %2 = tpu.matmul %0, %1, %cst {dimension_numbers = #tpu.dot_dimension_numbers<[1], [0], [0], [1], [0, 0, 1, 1], [], []>} : vector<512x128xbf16>, vector<128x128xbf16>, vector<512x128xf32> -> vector<512x128xf32>
    %c0_3 = arith.constant 0 : index
    %c0_4 = arith.constant 0 : index
    %3 = vector.load %arg3[%c0_3, %c0_4] : memref<1x128xf32, #tpu.memory_space<vmem>>, vector<1x128xf32>
    %4 = vector.broadcast %3 : vector<1x128xf32> to vector<512x128xf32>
    %5 = arith.addf %2, %4 : vector<512x128xf32>
    %cst_5 = arith.constant 0.000000e+00 : f32
    %6 = vector.broadcast %cst_5 : f32 to vector<512x128xf32>
    %7 = arith.cmpf oge, %5, %6 : vector<512x128xf32>
    %cst_6 = arith.constant 2.000000e-01 : f32
    %8 = vector.broadcast %cst_6 : f32 to vector<512x128xf32>
    %9 = arith.mulf %8, %5 : vector<512x128xf32>
    %10 = arith.select %7, %5, %9 : vector<512x128xi1>, vector<512x128xf32>
    %11 = arith.truncf %10 : vector<512x128xf32> to vector<512x128xbf16>
    %c0_7 = arith.constant 0 : index
    %c0_8 = arith.constant 0 : index
    %12 = vector.load %arg4[%c0_7, %c0_8] : memref<512x128xbf16, #tpu.memory_space<vmem>>, vector<512x128xbf16>
    tpu.vector_store %arg4[%c0_7, %c0_8], %11 {strides = array<i32>} : memref<512x128xbf16, #tpu.memory_space<vmem>>, vector<512x128xbf16>,
    return
  }
  func.func @transform_0(%arg0: i32) -> (i32, i32) {
    %c0_i32 = arith.constant 0 : i32
    %c0_i32_0 = arith.constant 0 : i32
    return %arg0, %c0_i32 : i32, i32
  }
  func.func @transform_1(%arg0: i32) -> (i32, i32) {
    %c0_i32 = arith.constant 0 : i32
    %c0_i32_0 = arith.constant 0 : i32
    %c0_i32_1 = arith.constant 0 : i32
    return %c0_i32, %c0_i32_0 : i32, i32
  }
  func.func @transform_2(%arg0: i32) -> (i32, i32) {
    %c0_i32 = arith.constant 0 : i32
    %c0_i32_0 = arith.constant 0 : i32
    %c0_i32_1 = arith.constant 0 : i32
    return %c0_i32, %c0_i32_0 : i32, i32
  }
  func.func @transform_3(%arg0: i32) -> (i32, i32) {
    %c0_i32 = arith.constant 0 : i32
    %c0_i32_0 = arith.constant 0 : i32
    return %arg0, %c0_i32 : i32, i32
  }
}

module attributes {stable_mosaic.version = 11 : i64} {
  func.func @_convmm_lrelu_kernel(%arg0: i32, %arg1: memref<128x256xbf16, #tpu.memory_space<vmem>>, %arg2: memref<256x128xbf16, #tpu.memory_space<vmem>>, %arg3: memref<1x128xf32, #tpu.memory_space<vmem>>, %arg4: memref<128x128xbf16, #tpu.memory_space<vmem>>) attributes {dimension_semantics = [#tpu.dimension_semantics<parallel>], iteration_bounds = array<i64: 1>, scalar_prefetch = 0 : i64, scratch_operands = 0 : i64, tpu.core_type = #tpu.core_type<tc>, window_params = [{transform_indices = @transform_0, window_bounds = array<i64: 128, 256>}, {pipeline_mode = #tpu.pipeline_mode<synchronous>, transform_indices = @transform_1, window_bounds = array<i64: 256, 128>}, {pipeline_mode = #tpu.pipeline_mode<synchronous>, transform_indices = @transform_2, window_bounds = array<i64: 1, 128>}, {transform_indices = @transform_3, window_bounds = array<i64: 128, 128>}]} {
    %c0 = arith.constant 0 : index
    %c0_0 = arith.constant 0 : index
    %0 = vector.load %arg1[%c0, %c0_0] : memref<128x256xbf16, #tpu.memory_space<vmem>>, vector<128x256xbf16>
    %c0_1 = arith.constant 0 : index
    %c0_2 = arith.constant 0 : index
    %1 = vector.load %arg2[%c0_1, %c0_2] : memref<256x128xbf16, #tpu.memory_space<vmem>>, vector<256x128xbf16>
    %cst = arith.constant dense<0.000000e+00> : vector<128x128xf32>
    %2 = tpu.matmul %0, %1, %cst {dimension_numbers = #tpu.dot_dimension_numbers<[1], [0], [0], [1], [0, 0, 1, 1], [], []>} : vector<128x256xbf16>, vector<256x128xbf16>, vector<128x128xf32> -> vector<128x128xf32>
    %c0_3 = arith.constant 0 : index
    %c0_4 = arith.constant 0 : index
    %3 = vector.load %arg3[%c0_3, %c0_4] : memref<1x128xf32, #tpu.memory_space<vmem>>, vector<1x128xf32>
    %4 = vector.broadcast %3 : vector<1x128xf32> to vector<128x128xf32>
    %5 = arith.addf %2, %4 : vector<128x128xf32>
    %cst_5 = arith.constant 0.000000e+00 : f32
    %6 = vector.broadcast %cst_5 : f32 to vector<128x128xf32>
    %7 = arith.cmpf oge, %5, %6 : vector<128x128xf32>
    %cst_6 = arith.constant 2.000000e-01 : f32
    %8 = vector.broadcast %cst_6 : f32 to vector<128x128xf32>
    %9 = arith.mulf %8, %5 : vector<128x128xf32>
    %10 = arith.select %7, %5, %9 : vector<128x128xi1>, vector<128x128xf32>
    %11 = arith.truncf %10 : vector<128x128xf32> to vector<128x128xbf16>
    %c0_7 = arith.constant 0 : index
    %c0_8 = arith.constant 0 : index
    %12 = vector.load %arg4[%c0_7, %c0_8] : memref<128x128xbf16, #tpu.memory_space<vmem>>, vector<128x128xbf16>
    tpu.vector_store %arg4[%c0_7, %c0_8], %11 {strides = array<i32>} : memref<128x128xbf16, #tpu.memory_space<vmem>>, vector<128x128xbf16>,
    return
  }
  func.func @transform_0(%arg0: i32) -> (i32, i32) {
    %c0_i32 = arith.constant 0 : i32
    %c0_i32_0 = arith.constant 0 : i32
    return %arg0, %c0_i32 : i32, i32
  }
  func.func @transform_1(%arg0: i32) -> (i32, i32) {
    %c0_i32 = arith.constant 0 : i32
    %c0_i32_0 = arith.constant 0 : i32
    %c0_i32_1 = arith.constant 0 : i32
    return %c0_i32, %c0_i32_0 : i32, i32
  }
  func.func @transform_2(%arg0: i32) -> (i32, i32) {
    %c0_i32 = arith.constant 0 : i32
    %c0_i32_0 = arith.constant 0 : i32
    %c0_i32_1 = arith.constant 0 : i32
    return %c0_i32, %c0_i32_0 : i32, i32
  }
  func.func @transform_3(%arg0: i32) -> (i32, i32) {
    %c0_i32 = arith.constant 0 : i32
    %c0_i32_0 = arith.constant 0 : i32
    return %arg0, %c0_i32 : i32, i32
  }
}

module attributes {stable_mosaic.version = 11 : i64} {
  func.func @_convmm_lrelu_kernel(%arg0: i32, %arg1: memref<32x512xbf16, #tpu.memory_space<vmem>>, %arg2: memref<512x128xbf16, #tpu.memory_space<vmem>>, %arg3: memref<1x128xf32, #tpu.memory_space<vmem>>, %arg4: memref<32x128xbf16, #tpu.memory_space<vmem>>) attributes {dimension_semantics = [#tpu.dimension_semantics<parallel>], iteration_bounds = array<i64: 1>, scalar_prefetch = 0 : i64, scratch_operands = 0 : i64, tpu.core_type = #tpu.core_type<tc>, window_params = [{transform_indices = @transform_0, window_bounds = array<i64: 32, 512>}, {pipeline_mode = #tpu.pipeline_mode<synchronous>, transform_indices = @transform_1, window_bounds = array<i64: 512, 128>}, {pipeline_mode = #tpu.pipeline_mode<synchronous>, transform_indices = @transform_2, window_bounds = array<i64: 1, 128>}, {transform_indices = @transform_3, window_bounds = array<i64: 32, 128>}]} {
    %c0 = arith.constant 0 : index
    %c0_0 = arith.constant 0 : index
    %0 = vector.load %arg1[%c0, %c0_0] : memref<32x512xbf16, #tpu.memory_space<vmem>>, vector<32x512xbf16>
    %c0_1 = arith.constant 0 : index
    %c0_2 = arith.constant 0 : index
    %1 = vector.load %arg2[%c0_1, %c0_2] : memref<512x128xbf16, #tpu.memory_space<vmem>>, vector<512x128xbf16>
    %cst = arith.constant dense<0.000000e+00> : vector<32x128xf32>
    %2 = tpu.matmul %0, %1, %cst {dimension_numbers = #tpu.dot_dimension_numbers<[1], [0], [0], [1], [0, 0, 1, 1], [], []>} : vector<32x512xbf16>, vector<512x128xbf16>, vector<32x128xf32> -> vector<32x128xf32>
    %c0_3 = arith.constant 0 : index
    %c0_4 = arith.constant 0 : index
    %3 = vector.load %arg3[%c0_3, %c0_4] : memref<1x128xf32, #tpu.memory_space<vmem>>, vector<1x128xf32>
    %4 = vector.broadcast %3 : vector<1x128xf32> to vector<32x128xf32>
    %5 = arith.addf %2, %4 : vector<32x128xf32>
    %cst_5 = arith.constant 0.000000e+00 : f32
    %6 = vector.broadcast %cst_5 : f32 to vector<32x128xf32>
    %7 = arith.cmpf oge, %5, %6 : vector<32x128xf32>
    %cst_6 = arith.constant 2.000000e-01 : f32
    %8 = vector.broadcast %cst_6 : f32 to vector<32x128xf32>
    %9 = arith.mulf %8, %5 : vector<32x128xf32>
    %10 = arith.select %7, %5, %9 : vector<32x128xi1>, vector<32x128xf32>
    %11 = arith.truncf %10 : vector<32x128xf32> to vector<32x128xbf16>
    %c0_7 = arith.constant 0 : index
    %c0_8 = arith.constant 0 : index
    %12 = vector.load %arg4[%c0_7, %c0_8] : memref<32x128xbf16, #tpu.memory_space<vmem>>, vector<32x128xbf16>
    tpu.vector_store %arg4[%c0_7, %c0_8], %11 {strides = array<i32>} : memref<32x128xbf16, #tpu.memory_space<vmem>>, vector<32x128xbf16>,
    return
  }
  func.func @transform_0(%arg0: i32) -> (i32, i32) {
    %c0_i32 = arith.constant 0 : i32
    %c0_i32_0 = arith.constant 0 : i32
    return %arg0, %c0_i32 : i32, i32
  }
  func.func @transform_1(%arg0: i32) -> (i32, i32) {
    %c0_i32 = arith.constant 0 : i32
    %c0_i32_0 = arith.constant 0 : i32
    %c0_i32_1 = arith.constant 0 : i32
    return %c0_i32, %c0_i32_0 : i32, i32
  }
  func.func @transform_2(%arg0: i32) -> (i32, i32) {
    %c0_i32 = arith.constant 0 : i32
    %c0_i32_0 = arith.constant 0 : i32
    %c0_i32_1 = arith.constant 0 : i32
    return %c0_i32, %c0_i32_0 : i32, i32
  }
  func.func @transform_3(%arg0: i32) -> (i32, i32) {
    %c0_i32 = arith.constant 0 : i32
    %c0_i32_0 = arith.constant 0 : i32
    return %arg0, %c0_i32 : i32, i32
  }
}

module attributes {stable_mosaic.version = 11 : i64} {
  func.func @_convmm_lrelu_kernel(%arg0: i32, %arg1: memref<16x512xbf16, #tpu.memory_space<vmem>>, %arg2: memref<512x128xbf16, #tpu.memory_space<vmem>>, %arg3: memref<1x128xf32, #tpu.memory_space<vmem>>, %arg4: memref<16x128xbf16, #tpu.memory_space<vmem>>) attributes {dimension_semantics = [#tpu.dimension_semantics<parallel>], iteration_bounds = array<i64: 1>, scalar_prefetch = 0 : i64, scratch_operands = 0 : i64, tpu.core_type = #tpu.core_type<tc>, window_params = [{transform_indices = @transform_0, window_bounds = array<i64: 16, 512>}, {pipeline_mode = #tpu.pipeline_mode<synchronous>, transform_indices = @transform_1, window_bounds = array<i64: 512, 128>}, {pipeline_mode = #tpu.pipeline_mode<synchronous>, transform_indices = @transform_2, window_bounds = array<i64: 1, 128>}, {transform_indices = @transform_3, window_bounds = array<i64: 16, 128>}]} {
    %c0 = arith.constant 0 : index
    %c0_0 = arith.constant 0 : index
    %0 = vector.load %arg1[%c0, %c0_0] : memref<16x512xbf16, #tpu.memory_space<vmem>>, vector<16x512xbf16>
    %c0_1 = arith.constant 0 : index
    %c0_2 = arith.constant 0 : index
    %1 = vector.load %arg2[%c0_1, %c0_2] : memref<512x128xbf16, #tpu.memory_space<vmem>>, vector<512x128xbf16>
    %cst = arith.constant dense<0.000000e+00> : vector<16x128xf32>
    %2 = tpu.matmul %0, %1, %cst {dimension_numbers = #tpu.dot_dimension_numbers<[1], [0], [0], [1], [0, 0, 1, 1], [], []>} : vector<16x512xbf16>, vector<512x128xbf16>, vector<16x128xf32> -> vector<16x128xf32>
    %c0_3 = arith.constant 0 : index
    %c0_4 = arith.constant 0 : index
    %3 = vector.load %arg3[%c0_3, %c0_4] : memref<1x128xf32, #tpu.memory_space<vmem>>, vector<1x128xf32>
    %4 = vector.broadcast %3 : vector<1x128xf32> to vector<16x128xf32>
    %5 = arith.addf %2, %4 : vector<16x128xf32>
    %cst_5 = arith.constant 0.000000e+00 : f32
    %6 = vector.broadcast %cst_5 : f32 to vector<16x128xf32>
    %7 = arith.cmpf oge, %5, %6 : vector<16x128xf32>
    %cst_6 = arith.constant 2.000000e-01 : f32
    %8 = vector.broadcast %cst_6 : f32 to vector<16x128xf32>
    %9 = arith.mulf %8, %5 : vector<16x128xf32>
    %10 = arith.select %7, %5, %9 : vector<16x128xi1>, vector<16x128xf32>
    %11 = arith.truncf %10 : vector<16x128xf32> to vector<16x128xbf16>
    %c0_7 = arith.constant 0 : index
    %c0_8 = arith.constant 0 : index
    %12 = vector.load %arg4[%c0_7, %c0_8] : memref<16x128xbf16, #tpu.memory_space<vmem>>, vector<16x128xbf16>
    tpu.vector_store %arg4[%c0_7, %c0_8], %11 {strides = array<i32>} : memref<16x128xbf16, #tpu.memory_space<vmem>>, vector<16x128xbf16>,
    return
  }
  func.func @transform_0(%arg0: i32) -> (i32, i32) {
    %c0_i32 = arith.constant 0 : i32
    %c0_i32_0 = arith.constant 0 : i32
    return %arg0, %c0_i32 : i32, i32
  }
  func.func @transform_1(%arg0: i32) -> (i32, i32) {
    %c0_i32 = arith.constant 0 : i32
    %c0_i32_0 = arith.constant 0 : i32
    %c0_i32_1 = arith.constant 0 : i32
    return %c0_i32, %c0_i32_0 : i32, i32
  }
  func.func @transform_2(%arg0: i32) -> (i32, i32) {
    %c0_i32 = arith.constant 0 : i32
    %c0_i32_0 = arith.constant 0 : i32
    %c0_i32_1 = arith.constant 0 : i32
    return %c0_i32, %c0_i32_0 : i32, i32
  }
  func.func @transform_3(%arg0: i32) -> (i32, i32) {
    %c0_i32 = arith.constant 0 : i32
    %c0_i32_0 = arith.constant 0 : i32
    return %arg0, %c0_i32 : i32, i32
  }
}

module attributes {stable_mosaic.version = 11 : i64} {
  func.func @_convmm_lrelu_kernel(%arg0: i32, %arg1: memref<16x512xbf16, #tpu.memory_space<vmem>>, %arg2: memref<512x128xbf16, #tpu.memory_space<vmem>>, %arg3: memref<1x128xf32, #tpu.memory_space<vmem>>, %arg4: memref<16x128xf32, #tpu.memory_space<vmem>>) attributes {dimension_semantics = [#tpu.dimension_semantics<parallel>], iteration_bounds = array<i64: 1>, scalar_prefetch = 0 : i64, scratch_operands = 0 : i64, tpu.core_type = #tpu.core_type<tc>, window_params = [{transform_indices = @transform_0, window_bounds = array<i64: 16, 512>}, {pipeline_mode = #tpu.pipeline_mode<synchronous>, transform_indices = @transform_1, window_bounds = array<i64: 512, 128>}, {pipeline_mode = #tpu.pipeline_mode<synchronous>, transform_indices = @transform_2, window_bounds = array<i64: 1, 128>}, {transform_indices = @transform_3, window_bounds = array<i64: 16, 128>}]} {
    %c0 = arith.constant 0 : index
    %c0_0 = arith.constant 0 : index
    %0 = vector.load %arg1[%c0, %c0_0] : memref<16x512xbf16, #tpu.memory_space<vmem>>, vector<16x512xbf16>
    %c0_1 = arith.constant 0 : index
    %c0_2 = arith.constant 0 : index
    %1 = vector.load %arg2[%c0_1, %c0_2] : memref<512x128xbf16, #tpu.memory_space<vmem>>, vector<512x128xbf16>
    %cst = arith.constant dense<0.000000e+00> : vector<16x128xf32>
    %2 = tpu.matmul %0, %1, %cst {dimension_numbers = #tpu.dot_dimension_numbers<[1], [0], [0], [1], [0, 0, 1, 1], [], []>} : vector<16x512xbf16>, vector<512x128xbf16>, vector<16x128xf32> -> vector<16x128xf32>
    %c0_3 = arith.constant 0 : index
    %c0_4 = arith.constant 0 : index
    %3 = vector.load %arg3[%c0_3, %c0_4] : memref<1x128xf32, #tpu.memory_space<vmem>>, vector<1x128xf32>
    %4 = vector.broadcast %3 : vector<1x128xf32> to vector<16x128xf32>
    %5 = arith.addf %2, %4 : vector<16x128xf32>
    %cst_5 = arith.constant 0.000000e+00 : f32
    %6 = vector.broadcast %cst_5 : f32 to vector<16x128xf32>
    %7 = arith.cmpf oge, %5, %6 : vector<16x128xf32>
    %cst_6 = arith.constant 2.000000e-01 : f32
    %8 = vector.broadcast %cst_6 : f32 to vector<16x128xf32>
    %9 = arith.mulf %8, %5 : vector<16x128xf32>
    %10 = arith.select %7, %5, %9 : vector<16x128xi1>, vector<16x128xf32>
    %c0_7 = arith.constant 0 : index
    %c0_8 = arith.constant 0 : index
    %11 = vector.load %arg4[%c0_7, %c0_8] : memref<16x128xf32, #tpu.memory_space<vmem>>, vector<16x128xf32>
    tpu.vector_store %arg4[%c0_7, %c0_8], %10 {strides = array<i32>} : memref<16x128xf32, #tpu.memory_space<vmem>>, vector<16x128xf32>,
    return
  }
  func.func @transform_0(%arg0: i32) -> (i32, i32) {
    %c0_i32 = arith.constant 0 : i32
    %c0_i32_0 = arith.constant 0 : i32
    return %arg0, %c0_i32 : i32, i32
  }
  func.func @transform_1(%arg0: i32) -> (i32, i32) {
    %c0_i32 = arith.constant 0 : i32
    %c0_i32_0 = arith.constant 0 : i32
    %c0_i32_1 = arith.constant 0 : i32
    return %c0_i32, %c0_i32_0 : i32, i32
  }
  func.func @transform_2(%arg0: i32) -> (i32, i32) {
    %c0_i32 = arith.constant 0 : i32
    %c0_i32_0 = arith.constant 0 : i32
    %c0_i32_1 = arith.constant 0 : i32
    return %c0_i32, %c0_i32_0 : i32, i32
  }
  func.func @transform_3(%arg0: i32) -> (i32, i32) {
    %c0_i32 = arith.constant 0 : i32
    %c0_i32_0 = arith.constant 0 : i32
    return %arg0, %c0_i32 : i32, i32
  }
}

</mosaic_0001>

<bundles_post_ra>
// kernel: patch_discriminator1_forward.6
= control target key start
LH: loop header
LB: loop body
LE: loop exit
PB: predicated region body
PF: predicated region fallthrough
CT: control target
= control target key end

     0   :  { %s2149_s12 = smov 0   ;;  %s2419_s0 = inlined_call_operand.vmem [shape: bf16[2048,256], index: 0, kind: input, shape index: {}]   ;;  %s2420_s1 = inlined_call_operand.vmem [shape: bf16[256,128], index: 1, kind: input, shape index: {}]   ;;  %s2421_s2 = inlined_call_operand.vmem [shape: f32[1,128], index: 2, kind: input, shape index: {}]   ;;  %s2422_s3 = inlined_call_operand.vmem [shape: bf16[2048,128], index: 3, kind: output, shape index: {}]  }
   0x1 LB: > { %s1554_s13 = sadd.s32 4294967295, %s2126_s12   ;;  %p1558_p0 = scmp.ge.s32.totalorder %s2126_s12, 1  ;;  %s2126_s12 = sphi %s2149_s12, %s13_s12  }
   0x2   : > { %p139_p1 = scmp.lt.s32.totalorder %s2126_s12, 5 }
   0x4   : > { %p140_p2 = pnand %p1558_p0, %p139_p1 }
   0x5   : > { %v2008_v0 = vld [vmem:[%s2420_s1] sm:$0xff] (!%p140_p2)   ;;  %v2128_v1 = vmov (!%p140_p2), 0   ;;  %s1559_s16 = sshll.u32 (!%p140_p2), %s1554_s13, 6  ;;  %v2009_v2 = vld [vmem:[%s2420_s1 + $0x8] sm:$0xff] (!%p140_p2)   ;;  %v2010_v3 = vld [vmem:[%s2420_s1 + $0x10] sm:$0xff] (!%p140_p2)  }
   0x6   : > { %143 = sbr.rel (%p140_p2) target bundleno = 412 (0x19c), region = 32  ;;  %697 = vmatprep.subr.bf16.mxu0 (!%p140_p2), %v2128_v1  ;;  %1967 = vmatprep.subr.bf16.mxu1 (!%p140_p2), %v2128_v1  ;;  %p165_p3 = scmp.lt.s32.totalorder (!%p140_p2), %s1559_s16, 255  ;;  %v2011_v4 = vld [vmem:[%s2420_s1 + $0x18] sm:$0xff] (!%p140_p2)   ;;  %v2012_v5 = vld [vmem:[%s2420_s1 + $0x20] sm:$0xff] (!%p140_p2)   ;;  %v2013_v7 = vld [vmem:[%s2420_s1 + $0x28] sm:$0xff] (!%p140_p2)  }
   0x7   : > { %698 = vmatpush1.bf16.msra.mxu0 (!%p140_p2), %v2008_v0  ;;  %1983 = vmatpush1.bf16.msra.mxu1 (!%p140_p2), %v2008_v0  ;;  %v2014_v9 = vld [vmem:[%s2420_s1 + $0x30] sm:$0xff] (!%p140_p2)   ;;  %v2015_v10 = vld [vmem:[%s2420_s1 + $0x38] sm:$0xff] (!%p140_p2)   ;;  %v2016_v11 = vld [vmem:[%s2420_s1 + $0x40] sm:$0xff] (!%p140_p2)  }
   0x8   : > { %699 = vmatprep.subr.bf16.mxu0 (!%p140_p2), %v2128_v1  ;;  %1968 = vmatprep.subr.bf16.mxu1 (!%p140_p2), %v2128_v1  ;;  %v2017_v12 = vld [vmem:[%s2420_s1 + $0x48] sm:$0xff] (!%p140_p2)   ;;  %v2018_v13 = vld [vmem:[%s2420_s1 + $0x50] sm:$0xff] (!%p140_p2)   ;;  %v2019_v14 = vld [vmem:[%s2420_s1 + $0x58] sm:$0xff] (!%p140_p2)  }
   0x9   : > { %v2020_v15 = vld [vmem:[%s2420_s1 + $0x60] sm:$0xff] (!%p140_p2)   ;;  %v2021_v16 = vld [vmem:[%s2420_s1 + $0x68] sm:$0xff] (!%p140_p2)   ;;  %v2022_v17 = vld [vmem:[%s2420_s1 + $0x70] sm:$0xff] (!%p140_p2)  }
   0xa   : > { %v2023_v18 = vld [vmem:[%s2420_s1 + $0x78] sm:$0xff] (!%p140_p2)  }
   0xb   : > { %700 = vmatpush1.bf16.msra.mxu0 (!%p140_p2), %v2009_v2  ;;  %1984 = vmatpush1.bf16.msra.mxu1 (!%p140_p2), %v2009_v2 }
   0xc   : > { %701 = vmatprep.subr.bf16.mxu0 (!%p140_p2), %v2128_v1  ;;  %1969 = vmatprep.subr.bf16.mxu1 (!%p140_p2), %v2128_v1 }
   0xd   : > { %s2424_s16 = smov (!%p165_p3, %s1559_s16), 255 }
   0xe   : > { %s1711_s23 = sshll.u32 %s2424_s16, 3 }
   0xf   : > { %702 = vmatpush1.bf16.msra.mxu0 %v2010_v3  ;;  %1985 = vmatpush1.bf16.msra.mxu1 %v2010_v3  ;;  %s2186_s28 = scalar_lea.vmem %s2419_s0, %s1711_s23 }
  0x10   : > { %703 = vmatprep.subr.bf16.mxu0 %v2128_v1  ;;  %1970 = vmatprep.subr.bf16.mxu1 %v2128_v1  ;;  %v2026_v6 = vld [vmem:[%s2186_s28 + $0x4] ss:$8 sps:$4 sm:$0xff]   ;;  %v2024_v19 = vld [vmem:[%s2186_s28] ss:$8 sps:$4 sm:$0xff]   ;;  %v2030_v21 = vld [vmem:[%s2186_s28 + $0x14] ss:$8 sps:$4 sm:$0xff]  }
  0x11   : > { %v2029_v8 = vld [vmem:[%s2186_s28 + $0x104] ss:$8 sps:$4 sm:$0xff]   ;;  %729 = vmatprep.mubr.bf16.mxu0 %v2026_v6  ;;  %v2027_v20 = vld [vmem:[%s2186_s28 + $0x100] ss:$8 sps:$4 sm:$0xff]   ;;  %v2032_v22 = vld [vmem:[%s2186_s28 + $0x114] ss:$8 sps:$4 sm:$0xff]  }
  0x12   : > { %857 = vmatprep.mubr.bf16.mxu1 %v2029_v8  ;;  %v2034_v23 = vld [vmem:[%s2186_s28 + $0x10] ss:$8 sps:$4 sm:$0xff]   ;;  %v2036_v25 = vld [vmem:[%s2186_s28 + $0x24] ss:$8 sps:$4 sm:$0xff]   ;;  %v2040_v27 = vld [vmem:[%s2186_s28 + $0x20] ss:$8 sps:$4 sm:$0xff]  }
  0x13   : > { %704 = vmatpush1.bf16.msra.mxu0 %v2011_v4  ;;  %1986 = vmatpush1.bf16.msra.mxu1 %v2011_v4  ;;  %v2035_v24 = vld [vmem:[%s2186_s28 + $0x110] ss:$8 sps:$4 sm:$0xff]   ;;  %v2038_v26 = vld [vmem:[%s2186_s28 + $0x124] ss:$8 sps:$4 sm:$0xff]   ;;  %v2041_v28 = vld [vmem:[%s2186_s28 + $0x120] ss:$8 sps:$4 sm:$0xff]  }
  0x14   : > { %705 = vmatprep.subr.bf16.mxu0 %v2128_v1  ;;  %1971 = vmatprep.subr.bf16.mxu1 %v2128_v1  ;;  %v2042_v29 = vld [vmem:[%s2186_s28 + $0x34] ss:$8 sps:$4 sm:$0xff]   ;;  %v2046_v31 = vld [vmem:[%s2186_s28 + $0x30] ss:$8 sps:$4 sm:$0xff]   ;;  %v2048_v33 = vld [vmem:[%s2186_s28 + $0x44] ss:$8 sps:$4 sm:$0xff]  }
  0x15   : > { %v2044_v30 = vld [vmem:[%s2186_s28 + $0x134] ss:$8 sps:$4 sm:$0xff]   ;;  %v2047_v32 = vld [vmem:[%s2186_s28 + $0x130] ss:$8 sps:$4 sm:$0xff]   ;;  %v2050_v34 = vld [vmem:[%s2186_s28 + $0x144] ss:$8 sps:$4 sm:$0xff]  }
  0x16   : > { %v2052_v35 = vld [vmem:[%s2186_s28 + $0x40] ss:$8 sps:$4 sm:$0xff]   ;;  %v2054_v37 = vld [vmem:[%s2186_s28 + $0x54] ss:$8 sps:$4 sm:$0xff]   ;;  %v2058_v39 = vld [vmem:[%s2186_s28 + $0x50] ss:$8 sps:$4 sm:$0xff]  }
  0x17   : > { %706 = vmatpush1.bf16.msra.mxu0 %v2012_v5  ;;  %1987 = vmatpush1.bf16.msra.mxu1 %v2012_v5  ;;  %v2053_v36 = vld [vmem:[%s2186_s28 + $0x140] ss:$8 sps:$4 sm:$0xff]   ;;  %v2056_v38 = vld [vmem:[%s2186_s28 + $0x154] ss:$8 sps:$4 sm:$0xff]   ;;  %v2059_v40 = vld [vmem:[%s2186_s28 + $0x150] ss:$8 sps:$4 sm:$0xff]  }
  0x18   : > { %707 = vmatprep.subr.bf16.mxu0 %v2128_v1  ;;  %1972 = vmatprep.subr.bf16.mxu1 %v2128_v1  ;;  %v2060_v41 = vld [vmem:[%s2186_s28 + $0x64] ss:$8 sps:$4 sm:$0xff]   ;;  %v2064_v43 = vld [vmem:[%s2186_s28 + $0x60] ss:$8 sps:$4 sm:$0xff]   ;;  %v2066_v45 = vld [vmem:[%s2186_s28 + $0x74] ss:$8 sps:$4 sm:$0xff]  }
  0x19   : > { %v2062_v42 = vld [vmem:[%s2186_s28 + $0x164] ss:$8 sps:$4 sm:$0xff]   ;;  %v2065_v44 = vld [vmem:[%s2186_s28 + $0x160] ss:$8 sps:$4 sm:$0xff]   ;;  %v2068_v46 = vld [vmem:[%s2186_s28 + $0x174] ss:$8 sps:$4 sm:$0xff]  }
  0x1a   : > { %v2070_v47 = vld [vmem:[%s2186_s28 + $0x70] ss:$8 sps:$4 sm:$0xff]   ;;  %v2072_v49 = vld [vmem:[%s2186_s28 + $0x84] ss:$8 sps:$4 sm:$0xff]   ;;  %v2076_v51 = vld [vmem:[%s2186_s28 + $0x80] ss:$8 sps:$4 sm:$0xff]  }
  0x1b   : > { %708 = vmatpush1.bf16.msra.mxu0 %v2013_v7  ;;  %1988 = vmatpush1.bf16.msra.mxu1 %v2013_v7  ;;  %v2071_v48 = vld [vmem:[%s2186_s28 + $0x170] ss:$8 sps:$4 sm:$0xff]   ;;  %v2074_v50 = vld [vmem:[%s2186_s28 + $0x184] ss:$8 sps:$4 sm:$0xff]   ;;  %v2077_v52 = vld [vmem:[%s2186_s28 + $0x180] ss:$8 sps:$4 sm:$0xff]  }
  0x1c   : > { %709 = vmatprep.subr.bf16.mxu0 %v2128_v1  ;;  %1973 = vmatprep.subr.bf16.mxu1 %v2128_v1  ;;  %v2078_v53 = vld [vmem:[%s2186_s28 + $0x94] ss:$8 sps:$4 sm:$0xff]   ;;  %v2082_v55 = vld [vmem:[%s2186_s28 + $0x90] ss:$8 sps:$4 sm:$0xff]   ;;  %v2084_v57 = vld [vmem:[%s2186_s28 + $0xa4] ss:$8 sps:$4 sm:$0xff]  }
  0x1d   : > { %v2080_v54 = vld [vmem:[%s2186_s28 + $0x194] ss:$8 sps:$4 sm:$0xff]   ;;  %v2083_v56 = vld [vmem:[%s2186_s28 + $0x190] ss:$8 sps:$4 sm:$0xff]   ;;  %v2086_v58 = vld [vmem:[%s2186_s28 + $0x1a4] ss:$8 sps:$4 sm:$0xff]  }
  0x1e   : > { %v2088_v59 = vld [vmem:[%s2186_s28 + $0xa0] ss:$8 sps:$4 sm:$0xff]   ;;  %v2090_v61 = vld [vmem:[%s2186_s28 + $0xb4] ss:$8 sps:$4 sm:$0xff]   ;;  %v2094_v63 = vld [vmem:[%s2186_s28 + $0xb0] ss:$8 sps:$4 sm:$0xff]  }
  0x1f   : > { %710 = vmatpush1.bf16.msra.mxu0 %v2014_v9  ;;  %1989 = vmatpush1.bf16.msra.mxu1 %v2014_v9  ;;  %v2089_v60 = vld [vmem:[%s2186_s28 + $0x1a0] ss:$8 sps:$4 sm:$0xff]   ;;  %v2092_v62 = vld [vmem:[%s2186_s28 + $0x1b4] ss:$8 sps:$4 sm:$0xff]   ;;  %v2095_v0 = vld [vmem:[%s2186_s28 + $0x1b0] ss:$8 sps:$4 sm:$0xff]  }
  0x20   : > { %711 = vmatprep.subr.bf16.mxu0 %v2128_v1  ;;  %1974 = vmatprep.subr.bf16.mxu1 %v2128_v1  ;;  %v2098_v2 = vld [vmem:[%s2186_s28 + $0x1c4] ss:$8 sps:$4 sm:$0xff]   ;;  %v2100_v3 = vld [vmem:[%s2186_s28 + $0xc0] ss:$8 sps:$4 sm:$0xff]   ;;  %v2102_v5 = vld [vmem:[%s2186_s28 + $0xd4] ss:$8 sps:$4 sm:$0xff]  }
  0x21   : > { %v2101_v4 = vld [vmem:[%s2186_s28 + $0x1c0] ss:$8 sps:$4 sm:$0xff]   ;;  %v2104_v6 = vld [vmem:[%s2186_s28 + $0x1d4] ss:$8 sps:$4 sm:$0xff]   ;;  %v2106_v7 = vld [vmem:[%s2186_s28 + $0xd0] ss:$8 sps:$4 sm:$0xff]  }
  0x22   : > { %v2107_v8 = vld [vmem:[%s2186_s28 + $0x1d0] ss:$8 sps:$4 sm:$0xff]   ;;  %v2108_v9 = vld [vmem:[%s2186_s28 + $0xe4] ss:$8 sps:$4 sm:$0xff]  }
  0x23   : > { %712 = vmatpush1.bf16.msra.mxu0 %v2015_v10  ;;  %1990 = vmatpush1.bf16.msra.mxu1 %v2015_v10  ;;  %v2110_v10 = vld [vmem:[%s2186_s28 + $0x1e4] ss:$8 sps:$4 sm:$0xff]  }
  0x24   : > { %713 = vmatprep.subr.bf16.mxu0 %v2128_v1  ;;  %1975 = vmatprep.subr.bf16.mxu1 %v2128_v1 }
  0x27   : > { %714 = vmatpush1.bf16.msra.mxu0 %v2016_v11  ;;  %1991 = vmatpush1.bf16.msra.mxu1 %v2016_v11  ;;  %v2112_v11 = vld [vmem:[%s2186_s28 + $0xe0] ss:$8 sps:$4 sm:$0xff]  }
  0x28   : > { %715 = vmatprep.subr.bf16.mxu0 %v2128_v1  ;;  %1976 = vmatprep.subr.bf16.mxu1 %v2128_v1 }
  0x2b   : > { %716 = vmatpush1.bf16.msra.mxu0 %v2017_v12  ;;  %1992 = vmatpush1.bf16.msra.mxu1 %v2017_v12  ;;  %v2113_v12 = vld [vmem:[%s2186_s28 + $0x1e0] ss:$8 sps:$4 sm:$0xff]  }
  0x2c   : > { %717 = vmatprep.subr.bf16.mxu0 %v2128_v1  ;;  %1977 = vmatprep.subr.bf16.mxu1 %v2128_v1 }
  0x2f   : > { %718 = vmatpush1.bf16.msra.mxu0 %v2018_v13  ;;  %1993 = vmatpush1.bf16.msra.mxu1 %v2018_v13  ;;  %v2114_v13 = vld [vmem:[%s2186_s28 + $0xf4] ss:$8 sps:$4 sm:$0xff]  }
  0x30   : > { %719 = vmatprep.subr.bf16.mxu0 %v2128_v1  ;;  %1978 = vmatprep.subr.bf16.mxu1 %v2128_v1 }
  0x33   : > { %720 = vmatpush1.bf16.msra.mxu0 %v2019_v14  ;;  %1994 = vmatpush1.bf16.msra.mxu1 %v2019_v14  ;;  %v2116_v14 = vld [vmem:[%s2186_s28 + $0x1f4] ss:$8 sps:$4 sm:$0xff]  }
  0x34   : > { %721 = vmatprep.subr.bf16.mxu0 %v2128_v1  ;;  %1979 = vmatprep.subr.bf16.mxu1 %v2128_v1 }
  0x37   : > { %722 = vmatpush1.bf16.msra.mxu0 %v2020_v15  ;;  %1995 = vmatpush1.bf16.msra.mxu1 %v2020_v15  ;;  %v2118_v15 = vld [vmem:[%s2186_s28 + $0xf0] ss:$8 sps:$4 sm:$0xff]  }
  0x38   : > { %723 = vmatprep.subr.bf16.mxu0 %v2128_v1  ;;  %1980 = vmatprep.subr.bf16.mxu1 %v2128_v1 }
  0x3b   : > { %724 = vmatpush1.bf16.msra.mxu0 %v2021_v16  ;;  %1996 = vmatpush1.bf16.msra.mxu1 %v2021_v16  ;;  %v2119_v16 = vld [vmem:[%s2186_s28 + $0x1f0] ss:$8 sps:$4 sm:$0xff]  }
  0x3c   : > { %725 = vmatprep.subr.bf16.mxu0 %v2128_v1  ;;  %1981 = vmatprep.subr.bf16.mxu1 %v2128_v1 }
  0x3f   : > { %726 = vmatpush1.bf16.msra.mxu0 %v2022_v17  ;;  %1997 = vmatpush1.bf16.msra.mxu1 %v2022_v17  ;;  %v2312_v17 = vld [vmem:[%s2421_s2] ss:$0 sm:$0xff] }
  0x40   : > { %727 = vmatprep.subr.bf16.mxu0 %v2128_v1  ;;  %1982 = vmatprep.subr.bf16.mxu1 %v2128_v1  ;;  %v2096_v1 = vld [vmem:[%s2186_s28 + $0xc4] ss:$8 sps:$4 sm:$0xff]   ;;  %s1563_s28 = sshll.u32 %s2424_s16, 2 }
  0x41   : > { %s2322_s4 = scalar_lea.vmem %s2422_s3, %s1563_s28 }
  0x43   : > { %728 = vmatpush1.bf16.msra.mxu0 %v2023_v18  ;;  %1998 = vmatpush1.bf16.msra.mxu1 %v2023_v18 }
  0x46   : > { %730 = vmatmul.mubr.bf16.vlgmr.msra.gmra.mrb[0].mxu0 %v2024_v19  ;;  %858 = vmatmul.mubr.bf16.vlgmr.msra.gmra.mrb[0].mxu1 %v2027_v20 }
  0x47   : > { %737 = vmatprep.mubr.bf16.mxu0 %v2030_v21  ;;  %865 = vmatprep.mubr.bf16.mxu1 %v2032_v22 }
  0x4e   : > { %738 = vmatmul.mubr.bf16.gmra.mrb[4].mxu0 %v2034_v23  ;;  %866 = vmatmul.mubr.bf16.gmra.mrb[4].mxu1 %v2035_v24 }
  0x4f   : > { %745 = vmatprep.mubr.bf16.mxu0 %v2036_v25  ;;  %873 = vmatprep.mubr.bf16.mxu1 %v2038_v26 }
  0x56   : > { %746 = vmatmul.mubr.bf16.gmra.mrb[8].mxu0 %v2040_v27  ;;  %874 = vmatmul.mubr.bf16.gmra.mrb[8].mxu1 %v2041_v28 }
  0x57   : > { %753 = vmatprep.mubr.bf16.mxu0 %v2042_v29  ;;  %881 = vmatprep.mubr.bf16.mxu1 %v2044_v30 }
  0x5e   : > { %754 = vmatmul.mubr.bf16.gmra.mrb[12].mxu0 %v2046_v31  ;;  %882 = vmatmul.mubr.bf16.gmra.mrb[12].mxu1 %v2047_v32 }
  0x5f   : > { %761 = vmatprep.mubr.bf16.mxu0 %v2048_v33  ;;  %889 = vmatprep.mubr.bf16.mxu1 %v2050_v34 }
  0x66   : > { %762 = vmatmul.mubr.bf16.gmra.mrb[16].mxu0 %v2052_v35  ;;  %890 = vmatmul.mubr.bf16.gmra.mrb[16].mxu1 %v2053_v36 }
  0x67   : > { %769 = vmatprep.mubr.bf16.mxu0 %v2054_v37  ;;  %897 = vmatprep.mubr.bf16.mxu1 %v2056_v38 }
  0x6e   : > { %770 = vmatmul.mubr.bf16.gmra.mrb[20].mxu0 %v2058_v39  ;;  %898 = vmatmul.mubr.bf16.gmra.mrb[20].mxu1 %v2059_v40 }
  0x6f   : > { %777 = vmatprep.mubr.bf16.mxu0 %v2060_v41  ;;  %905 = vmatprep.mubr.bf16.mxu1 %v2062_v42 }
  0x76   : > { %778 = vmatmul.mubr.bf16.gmra.mrb[24].mxu0 %v2064_v43  ;;  %906 = vmatmul.mubr.bf16.gmra.mrb[24].mxu1 %v2065_v44 }
  0x77   : > { %785 = vmatprep.mubr.bf16.mxu0 %v2066_v45  ;;  %913 = vmatprep.mubr.bf16.mxu1 %v2068_v46 }
  0x7e   : > { %786 = vmatmul.mubr.bf16.gmra.mrb[28].mxu0 %v2070_v47  ;;  %914 = vmatmul.mubr.bf16.gmra.mrb[28].mxu1 %v2071_v48 }
  0x7f   : > { %793 = vmatprep.mubr.bf16.mxu0 %v2072_v49  ;;  %921 = vmatprep.mubr.bf16.mxu1 %v2074_v50 }
  0x86   : > { %794 = vmatmul.mubr.bf16.gmra.mrb[32].mxu0 %v2076_v51  ;;  %922 = vmatmul.mubr.bf16.gmra.mrb[32].mxu1 %v2077_v52 }
  0x87   : > { %801 = vmatprep.mubr.bf16.mxu0 %v2078_v53  ;;  %929 = vmatprep.mubr.bf16.mxu1 %v2080_v54 }
  0x8e   : > { %802 = vmatmul.mubr.bf16.gmra.mrb[36].mxu0 %v2082_v55  ;;  %930 = vmatmul.mubr.bf16.gmra.mrb[36].mxu1 %v2083_v56 }
  0x8f   : > { %809 = vmatprep.mubr.bf16.mxu0 %v2084_v57  ;;  %937 = vmatprep.mubr.bf16.mxu1 %v2086_v58 }
  0x96   : > { %810 = vmatmul.mubr.bf16.gmra.mrb[40].mxu0 %v2088_v59  ;;  %938 = vmatmul.mubr.bf16.gmra.mrb[40].mxu1 %v2089_v60 }
  0x97   : > { %817 = vmatprep.mubr.bf16.mxu0 %v2090_v61  ;;  %945 = vmatprep.mubr.bf16.mxu1 %v2092_v62 }
  0x9e   : > { %818 = vmatmul.mubr.bf16.gmra.mrb[44].mxu0 %v2094_v63  ;;  %946 = vmatmul.mubr.bf16.gmra.mrb[44].mxu1 %v2095_v0 }
  0x9f   : > { %825 = vmatprep.mubr.bf16.mxu0 %v2096_v1  ;;  %953 = vmatprep.mubr.bf16.mxu1 %v2098_v2 }
  0xa6   : > { %826 = vmatmul.mubr.bf16.gmra.mrb[48].mxu0 %v2100_v3  ;;  %954 = vmatmul.mubr.bf16.gmra.mrb[48].mxu1 %v2101_v4 }
  0xa7   : > { %833 = vmatprep.mubr.bf16.mxu0 %v2102_v5  ;;  %961 = vmatprep.mubr.bf16.mxu1 %v2104_v6 }
  0xae   : > { %834 = vmatmul.mubr.bf16.gmra.mrb[52].mxu0 %v2106_v7  ;;  %962 = vmatmul.mubr.bf16.gmra.mrb[52].mxu1 %v2107_v8 }
  0xaf   : > { %841 = vmatprep.mubr.bf16.mxu0 %v2108_v9  ;;  %969 = vmatprep.mubr.bf16.mxu1 %v2110_v10 }
  0xb6   : > { %842 = vmatmul.mubr.bf16.gmra.mrb[56].mxu0 %v2112_v11  ;;  %970 = vmatmul.mubr.bf16.gmra.mrb[56].mxu1 %v2113_v12 }
  0xb7   : > { %849 = vmatprep.mubr.bf16.mxu0 %v2114_v13  ;;  %977 = vmatprep.mubr.bf16.mxu1 %v2116_v14 }
  0xbe   : > { %850 = vmatmul.mubr.bf16.gmra.mrb[60].mxu0 %v2118_v15  ;;  %978 = vmatmul.mubr.bf16.gmra.mrb[60].mxu1 %v2119_v16 }
 0x119   : > { %v731_v18 = vpop.f32.mrb[0].mxu0  ;;  %v859_v19 = vpop.f32.mrb[0].mxu1 }
 0x11a   : > { %v732_v20 = vadd.f32 %v2312_v17, %v731_v18  ;;  %v860_v21 = vadd.f32 %v2312_v17, %v859_v19  ;;  %v733_v22 = vpop.f32.mrb[1].mxu0  ;;  %v861_v23 = vpop.f32.mrb[1].mxu1 }
 0x11b   : > { %v734_v24 = vpop.f32.mrb[2].mxu0  ;;  %v862_v25 = vpop.f32.mrb[2].mxu1 }
 0x11c   : > { %v1050_v26 = vmul.f32 0.2, %v732_v20  ;;  %v1082_v27 = vmul.f32 0.2, %v860_v21  ;;  %v735_v28 = vadd.f32 %v2312_v17, %v734_v24  ;;  %v863_v29 = vadd.f32 %v2312_v17, %v862_v25  ;;  %v736_v30 = vpop.f32.mrb[3].mxu0  ;;  %v864_v31 = vpop.f32.mrb[3].mxu1 }
 0x11d   : > { %vm986_vm0 = vcmp.ge.f32.partialorder %v732_v20, 0.0  ;;  %vm1018_vm1 = vcmp.ge.f32.partialorder %v860_v21, 0.0 }
 0x11e   : > { %vm987_vm2 = vcmp.ge.f32.partialorder %v735_v28, 0.0  ;;  %v1051_v32 = vmul.f32 0.2, %v735_v28  ;;  %vm1019_vm3 = vcmp.ge.f32.partialorder %v863_v29, 0.0  ;;  %v1083_v33 = vmul.f32 0.2, %v863_v29 }
 0x11f   : > { %v1114_v34 = vsel %vm986_vm0, %v732_v20, %v1050_v26  ;;  %v1146_v35 = vsel %vm1018_vm1, %v860_v21, %v1082_v27 }
 0x120   : > { %v1115_v36 = vsel %vm987_vm2, %v735_v28, %v1051_v32  ;;  %v1147_v37 = vsel %vm1019_vm3, %v863_v29, %v1083_v33 }
 0x121   : > { %v739_v38 = vpop.f32.mrb[4].mxu0  ;;  %v867_v39 = vpop.f32.mrb[4].mxu1  ;;  %v1779_v40 = vpack.c.bf16 %v1115_v36, %v1114_v34  ;;  %v1859_v41 = vpack.c.bf16 %v1147_v37, %v1146_v35 }
 0x122   : > { %v740_v42 = vadd.f32 %v2312_v17, %v739_v38  ;;  %v868_v43 = vadd.f32 %v2312_v17, %v867_v39  ;;  %v741_v44 = vpop.f32.mrb[5].mxu0  ;;  %v869_v45 = vpop.f32.mrb[5].mxu1 }
 0x123   : > { %v742_v46 = vpop.f32.mrb[6].mxu0  ;;  %v870_v47 = vpop.f32.mrb[6].mxu1  ;;  %1780 = vst [vmem:[%s2322_s4] sm:$0xff] %v1779_v40   ;;  %1951 = vst [vmem:[%s2322_s4 + $0x80] sm:$0xff] %v1859_v41  }
 0x124   : > { %v1052_v48 = vmul.f32 0.2, %v740_v42  ;;  %v1084_v49 = vmul.f32 0.2, %v868_v43  ;;  %v743_v50 = vadd.f32 %v2312_v17, %v742_v46  ;;  %v871_v51 = vadd.f32 %v2312_v17, %v870_v47  ;;  %v744_v52 = vpop.f32.mrb[7].mxu0  ;;  %v872_v53 = vpop.f32.mrb[7].mxu1 }
 0x125   : > { %vm988_vm4 = vcmp.ge.f32.partialorder %v740_v42, 0.0  ;;  %vm1020_vm5 = vcmp.ge.f32.partialorder %v868_v43, 0.0 }
 0x126   : > { %vm989_vm6 = vcmp.ge.f32.partialorder %v743_v50, 0.0  ;;  %v1053_v54 = vmul.f32 0.2, %v743_v50  ;;  %vm1021_vm7 = vcmp.ge.f32.partialorder %v871_v51, 0.0  ;;  %v1085_v55 = vmul.f32 0.2, %v871_v51 }
 0x127   : > { %v1116_v56 = vsel %vm988_vm4, %v740_v42, %v1052_v48  ;;  %v1148_v57 = vsel %vm1020_vm5, %v868_v43, %v1084_v49 }
 0x128   : > { %v1117_v58 = vsel %vm989_vm6, %v743_v50, %v1053_v54  ;;  %v1149_v59 = vsel %vm1021_vm7, %v871_v51, %v1085_v55 }
 0x129   : > { %v747_v60 = vpop.f32.mrb[8].mxu0  ;;  %v875_v61 = vpop.f32.mrb[8].mxu1  ;;  %v1784_v62 = vpack.c.bf16 %v1117_v58, %v1116_v56  ;;  %v1864_v63 = vpack.c.bf16 %v1149_v59, %v1148_v57 }
 0x12a   : > { %v748_v0 = vadd.f32 %v2312_v17, %v747_v60  ;;  %v876_v1 = vadd.f32 %v2312_v17, %v875_v61  ;;  %v749_v2 = vpop.f32.mrb[9].mxu0  ;;  %v877_v3 = vpop.f32.mrb[9].mxu1 }
 0x12b   : > { %v750_v4 = vpop.f32.mrb[10].mxu0  ;;  %v878_v5 = vpop.f32.mrb[10].mxu1  ;;  %1936 = vst [vmem:[%s2322_s4 + $0x8] sm:$0xff] %v1784_v62   ;;  %1952 = vst [vmem:[%s2322_s4 + $0x88] sm:$0xff] %v1864_v63  }
 0x12c   : > { %v1054_v6 = vmul.f32 0.2, %v748_v0  ;;  %v1086_v7 = vmul.f32 0.2, %v876_v1  ;;  %v751_v8 = vadd.f32 %v2312_v17, %v750_v4  ;;  %v879_v9 = vadd.f32 %v2312_v17, %v878_v5  ;;  %v752_v10 = vpop.f32.mrb[11].mxu0  ;;  %v880_v11 = vpop.f32.mrb[11].mxu1 }
 0x12d   : > { %vm990_vm8 = vcmp.ge.f32.partialorder %v748_v0, 0.0  ;;  %vm1022_vm9 = vcmp.ge.f32.partialorder %v876_v1, 0.0 }
 0x12e   : > { %vm991_vm10 = vcmp.ge.f32.partialorder %v751_v8, 0.0  ;;  %v1055_v12 = vmul.f32 0.2, %v751_v8  ;;  %vm1023_vm11 = vcmp.ge.f32.partialorder %v879_v9, 0.0  ;;  %v1087_v13 = vmul.f32 0.2, %v879_v9 }
 0x12f   : > { %v1118_v14 = vsel %vm990_vm8, %v748_v0, %v1054_v6  ;;  %v1150_v15 = vsel %vm1022_vm9, %v876_v1, %v1086_v7 }
 0x130   : > { %v1119_v16 = vsel %vm991_vm10, %v751_v8, %v1055_v12  ;;  %v1151_v18 = vsel %vm1023_vm11, %v879_v9, %v1087_v13 }
 0x131   : > { %v755_v19 = vpop.f32.mrb[12].mxu0  ;;  %v883_v20 = vpop.f32.mrb[12].mxu1  ;;  %v1789_v21 = vpack.c.bf16 %v1119_v16, %v1118_v14  ;;  %v1869_v22 = vpack.c.bf16 %v1151_v18, %v1150_v15 }
 0x132   : > { %v756_v23 = vadd.f32 %v2312_v17, %v755_v19  ;;  %v884_v24 = vadd.f32 %v2312_v17, %v883_v20  ;;  %v757_v25 = vpop.f32.mrb[13].mxu0  ;;  %v885_v26 = vpop.f32.mrb[13].mxu1 }
 0x133   : > { %v758_v27 = vpop.f32.mrb[14].mxu0  ;;  %v886_v28 = vpop.f32.mrb[14].mxu1  ;;  %1937 = vst [vmem:[%s2322_s4 + $0x10] sm:$0xff] %v1789_v21   ;;  %1953 = vst [vmem:[%s2322_s4 + $0x90] sm:$0xff] %v1869_v22  }
 0x134   : > { %v1056_v29 = vmul.f32 0.2, %v756_v23  ;;  %v1088_v30 = vmul.f32 0.2, %v884_v24  ;;  %v759_v31 = vadd.f32 %v2312_v17, %v758_v27  ;;  %v887_v32 = vadd.f32 %v2312_v17, %v886_v28  ;;  %v760_v33 = vpop.f32.mrb[15].mxu0  ;;  %v888_v34 = vpop.f32.mrb[15].mxu1 }
 0x135   : > { %vm992_vm12 = vcmp.ge.f32.partialorder %v756_v23, 0.0  ;;  %vm1024_vm13 = vcmp.ge.f32.partialorder %v884_v24, 0.0 }
 0x136   : > { %vm993_vm14 = vcmp.ge.f32.partialorder %v759_v31, 0.0  ;;  %v1057_v35 = vmul.f32 0.2, %v759_v31  ;;  %vm1025_vm15 = vcmp.ge.f32.partialorder %v887_v32, 0.0  ;;  %v1089_v36 = vmul.f32 0.2, %v887_v32 }
 0x137   : > { %v1120_v37 = vsel %vm992_vm12, %v756_v23, %v1056_v29  ;;  %v1152_v38 = vsel %vm1024_vm13, %v884_v24, %v1088_v30 }
 0x138   : > { %v1121_v39 = vsel %vm993_vm14, %v759_v31, %v1057_v35  ;;  %v1153_v40 = vsel %vm1025_vm15, %v887_v32, %v1089_v36 }
 0x139   : > { %v763_v41 = vpop.f32.mrb[16].mxu0  ;;  %v891_v42 = vpop.f32.mrb[16].mxu1  ;;  %v1794_v43 = vpack.c.bf16 %v1121_v39, %v1120_v37  ;;  %v1874_v44 = vpack.c.bf16 %v1153_v40, %v1152_v38 }
 0x13a   : > { %v764_v45 = vadd.f32 %v2312_v17, %v763_v41  ;;  %v892_v46 = vadd.f32 %v2312_v17, %v891_v42  ;;  %v765_v47 = vpop.f32.mrb[17].mxu0  ;;  %v893_v48 = vpop.f32.mrb[17].mxu1 }
 0x13b   : > { %v766_v49 = vpop.f32.mrb[18].mxu0  ;;  %v894_v50 = vpop.f32.mrb[18].mxu1  ;;  %1938 = vst [vmem:[%s2322_s4 + $0x18] sm:$0xff] %v1794_v43   ;;  %1954 = vst [vmem:[%s2322_s4 + $0x98] sm:$0xff] %v1874_v44  }
 0x13c   : > { %v1058_v51 = vmul.f32 0.2, %v764_v45  ;;  %v1090_v52 = vmul.f32 0.2, %v892_v46  ;;  %v767_v53 = vadd.f32 %v2312_v17, %v766_v49  ;;  %v895_v54 = vadd.f32 %v2312_v17, %v894_v50  ;;  %v768_v55 = vpop.f32.mrb[19].mxu0  ;;  %v896_v56 = vpop.f32.mrb[19].mxu1 }
 0x13d   : > { %vm994_vm0 = vcmp.ge.f32.partialorder %v764_v45, 0.0  ;;  %vm1026_vm1 = vcmp.ge.f32.partialorder %v892_v46, 0.0 }
 0x13e   : > { %vm995_vm2 = vcmp.ge.f32.partialorder %v767_v53, 0.0  ;;  %v1059_v57 = vmul.f32 0.2, %v767_v53  ;;  %vm1027_vm3 = vcmp.ge.f32.partialorder %v895_v54, 0.0  ;;  %v1091_v58 = vmul.f32 0.2, %v895_v54 }
 0x13f   : > { %v1122_v59 = vsel %vm994_vm0, %v764_v45, %v1058_v51  ;;  %v1154_v60 = vsel %vm1026_vm1, %v892_v46, %v1090_v52 }
 0x140   : > { %v1123_v61 = vsel %vm995_vm2, %v767_v53, %v1059_v57  ;;  %v1155_v62 = vsel %vm1027_vm3, %v895_v54, %v1091_v58 }
 0x141   : > { %v771_v63 = vpop.f32.mrb[20].mxu0  ;;  %v899_v0 = vpop.f32.mrb[20].mxu1  ;;  %v1799_v1 = vpack.c.bf16 %v1123_v61, %v1122_v59  ;;  %v1879_v2 = vpack.c.bf16 %v1155_v62, %v1154_v60 }
 0x142   : > { %v772_v3 = vadd.f32 %v2312_v17, %v771_v63  ;;  %v900_v4 = vadd.f32 %v2312_v17, %v899_v0  ;;  %v773_v5 = vpop.f32.mrb[21].mxu0  ;;  %v901_v6 = vpop.f32.mrb[21].mxu1 }
 0x143   : > { %v774_v7 = vpop.f32.mrb[22].mxu0  ;;  %v902_v8 = vpop.f32.mrb[22].mxu1  ;;  %1939 = vst [vmem:[%s2322_s4 + $0x20] sm:$0xff] %v1799_v1   ;;  %1955 = vst [vmem:[%s2322_s4 + $0xa0] sm:$0xff] %v1879_v2  }
 0x144   : > { %v1060_v9 = vmul.f32 0.2, %v772_v3  ;;  %v1092_v10 = vmul.f32 0.2, %v900_v4  ;;  %v775_v11 = vadd.f32 %v2312_v17, %v774_v7  ;;  %v903_v12 = vadd.f32 %v2312_v17, %v902_v8  ;;  %v776_v13 = vpop.f32.mrb[23].mxu0  ;;  %v904_v14 = vpop.f32.mrb[23].mxu1 }
 0x145   : > { %vm996_vm4 = vcmp.ge.f32.partialorder %v772_v3, 0.0  ;;  %vm1028_vm5 = vcmp.ge.f32.partialorder %v900_v4, 0.0 }
 0x146   : > { %vm997_vm6 = vcmp.ge.f32.partialorder %v775_v11, 0.0  ;;  %v1061_v15 = vmul.f32 0.2, %v775_v11  ;;  %vm1029_vm7 = vcmp.ge.f32.partialorder %v903_v12, 0.0  ;;  %v1093_v16 = vmul.f32 0.2, %v903_v12 }
 0x147   : > { %v1124_v18 = vsel %vm996_vm4, %v772_v3, %v1060_v9  ;;  %v1156_v19 = vsel %vm1028_vm5, %v900_v4, %v1092_v10 }
 0x148   : > { %v1125_v20 = vsel %vm997_vm6, %v775_v11, %v1061_v15  ;;  %v1157_v21 = vsel %vm1029_vm7, %v903_v12, %v1093_v16 }
 0x149   : > { %v779_v22 = vpop.f32.mrb[24].mxu0  ;;  %v907_v23 = vpop.f32.mrb[24].mxu1  ;;  %v1804_v24 = vpack.c.bf16 %v1125_v20, %v1124_v18  ;;  %v1884_v25 = vpack.c.bf16 %v1157_v21, %v1156_v19 }
 0x14a   : > { %v780_v26 = vadd.f32 %v2312_v17, %v779_v22  ;;  %v908_v27 = vadd.f32 %v2312_v17, %v907_v23  ;;  %v781_v28 = vpop.f32.mrb[25].mxu0  ;;  %v909_v29 = vpop.f32.mrb[25].mxu1 }
 0x14b   : > { %v782_v30 = vpop.f32.mrb[26].mxu0  ;;  %v910_v31 = vpop.f32.mrb[26].mxu1  ;;  %1940 = vst [vmem:[%s2322_s4 + $0x28] sm:$0xff] %v1804_v24   ;;  %1956 = vst [vmem:[%s2322_s4 + $0xa8] sm:$0xff] %v1884_v25  }
 0x14c   : > { %v1062_v32 = vmul.f32 0.2, %v780_v26  ;;  %v1094_v33 = vmul.f32 0.2, %v908_v27  ;;  %v783_v34 = vadd.f32 %v2312_v17, %v782_v30  ;;  %v911_v35 = vadd.f32 %v2312_v17, %v910_v31  ;;  %v784_v36 = vpop.f32.mrb[27].mxu0  ;;  %v912_v37 = vpop.f32.mrb[27].mxu1 }
 0x14d   : > { %vm998_vm8 = vcmp.ge.f32.partialorder %v780_v26, 0.0  ;;  %vm1030_vm9 = vcmp.ge.f32.partialorder %v908_v27, 0.0 }
 0x14e   : > { %vm999_vm10 = vcmp.ge.f32.partialorder %v783_v34, 0.0  ;;  %v1063_v38 = vmul.f32 0.2, %v783_v34  ;;  %vm1031_vm11 = vcmp.ge.f32.partialorder %v911_v35, 0.0  ;;  %v1095_v39 = vmul.f32 0.2, %v911_v35 }
 0x14f   : > { %v1126_v40 = vsel %vm998_vm8, %v780_v26, %v1062_v32  ;;  %v1158_v41 = vsel %vm1030_vm9, %v908_v27, %v1094_v33 }
 0x150   : > { %v1127_v42 = vsel %vm999_vm10, %v783_v34, %v1063_v38  ;;  %v1159_v43 = vsel %vm1031_vm11, %v911_v35, %v1095_v39 }
 0x151   : > { %v787_v44 = vpop.f32.mrb[28].mxu0  ;;  %v915_v45 = vpop.f32.mrb[28].mxu1  ;;  %v1809_v46 = vpack.c.bf16 %v1127_v42, %v1126_v40  ;;  %v1889_v47 = vpack.c.bf16 %v1159_v43, %v1158_v41 }
 0x152   : > { %v788_v48 = vadd.f32 %v2312_v17, %v787_v44  ;;  %v916_v49 = vadd.f32 %v2312_v17, %v915_v45  ;;  %v789_v50 = vpop.f32.mrb[29].mxu0  ;;  %v917_v51 = vpop.f32.mrb[29].mxu1 }
 0x153   : > { %v790_v52 = vpop.f32.mrb[30].mxu0  ;;  %v918_v53 = vpop.f32.mrb[30].mxu1  ;;  %1941 = vst [vmem:[%s2322_s4 + $0x30] sm:$0xff] %v1809_v46   ;;  %1957 = vst [vmem:[%s2322_s4 + $0xb0] sm:$0xff] %v1889_v47  }
 0x154   : > { %v1064_v54 = vmul.f32 0.2, %v788_v48  ;;  %v1096_v55 = vmul.f32 0.2, %v916_v49  ;;  %v791_v56 = vadd.f32 %v2312_v17, %v790_v52  ;;  %v919_v57 = vadd.f32 %v2312_v17, %v918_v53  ;;  %v792_v58 = vpop.f32.mrb[31].mxu0  ;;  %v920_v59 = vpop.f32.mrb[31].mxu1 }
 0x155   : > { %vm1000_vm12 = vcmp.ge.f32.partialorder %v788_v48, 0.0  ;;  %vm1032_vm13 = vcmp.ge.f32.partialorder %v916_v49, 0.0 }
 0x156   : > { %vm1001_vm14 = vcmp.ge.f32.partialorder %v791_v56, 0.0  ;;  %v1065_v60 = vmul.f32 0.2, %v791_v56  ;;  %vm1033_vm15 = vcmp.ge.f32.partialorder %v919_v57, 0.0  ;;  %v1097_v61 = vmul.f32 0.2, %v919_v57 }
 0x157   : > { %v1128_v62 = vsel %vm1000_vm12, %v788_v48, %v1064_v54  ;;  %v1160_v63 = vsel %vm1032_vm13, %v916_v49, %v1096_v55 }
 0x158   : > { %v1129_v0 = vsel %vm1001_vm14, %v791_v56, %v1065_v60  ;;  %v1161_v1 = vsel %vm1033_vm15, %v919_v57, %v1097_v61 }
 0x159   : > { %v795_v2 = vpop.f32.mrb[32].mxu0  ;;  %v923_v3 = vpop.f32.mrb[32].mxu1  ;;  %v1814_v4 = vpack.c.bf16 %v1129_v0, %v1128_v62  ;;  %v1894_v5 = vpack.c.bf16 %v1161_v1, %v1160_v63 }
 0x15a   : > { %v796_v6 = vadd.f32 %v2312_v17, %v795_v2  ;;  %v924_v7 = vadd.f32 %v2312_v17, %v923_v3  ;;  %v797_v8 = vpop.f32.mrb[33].mxu0  ;;  %v925_v9 = vpop.f32.mrb[33].mxu1 }
 0x15b   : > { %v798_v10 = vpop.f32.mrb[34].mxu0  ;;  %v926_v11 = vpop.f32.mrb[34].mxu1  ;;  %1942 = vst [vmem:[%s2322_s4 + $0x38] sm:$0xff] %v1814_v4   ;;  %1958 = vst [vmem:[%s2322_s4 + $0xb8] sm:$0xff] %v1894_v5  }
 0x15c   : > { %v1066_v12 = vmul.f32 0.2, %v796_v6  ;;  %v1098_v13 = vmul.f32 0.2, %v924_v7  ;;  %v799_v14 = vadd.f32 %v2312_v17, %v798_v10  ;;  %v927_v15 = vadd.f32 %v2312_v17, %v926_v11  ;;  %v800_v16 = vpop.f32.mrb[35].mxu0  ;;  %v928_v18 = vpop.f32.mrb[35].mxu1 }
 0x15d   : > { %vm1002_vm0 = vcmp.ge.f32.partialorder %v796_v6, 0.0  ;;  %vm1034_vm1 = vcmp.ge.f32.partialorder %v924_v7, 0.0 }
 0x15e   : > { %vm1003_vm2 = vcmp.ge.f32.partialorder %v799_v14, 0.0  ;;  %v1067_v19 = vmul.f32 0.2, %v799_v14  ;;  %vm1035_vm3 = vcmp.ge.f32.partialorder %v927_v15, 0.0  ;;  %v1099_v20 = vmul.f32 0.2, %v927_v15 }
 0x15f   : > { %v1130_v21 = vsel %vm1002_vm0, %v796_v6, %v1066_v12  ;;  %v1162_v22 = vsel %vm1034_vm1, %v924_v7, %v1098_v13 }
 0x160   : > { %v1131_v23 = vsel %vm1003_vm2, %v799_v14, %v1067_v19  ;;  %v1163_v24 = vsel %vm1035_vm3, %v927_v15, %v1099_v20 }
 0x161   : > { %v803_v25 = vpop.f32.mrb[36].mxu0  ;;  %v931_v26 = vpop.f32.mrb[36].mxu1  ;;  %v1819_v27 = vpack.c.bf16 %v1131_v23, %v1130_v21  ;;  %v1899_v28 = vpack.c.bf16 %v1163_v24, %v1162_v22 }
 0x162   : > { %v804_v29 = vadd.f32 %v2312_v17, %v803_v25  ;;  %v932_v30 = vadd.f32 %v2312_v17, %v931_v26  ;;  %v805_v31 = vpop.f32.mrb[37].mxu0  ;;  %v933_v32 = vpop.f32.mrb[37].mxu1 }
 0x163   : > { %v806_v33 = vpop.f32.mrb[38].mxu0  ;;  %v934_v34 = vpop.f32.mrb[38].mxu1  ;;  %1943 = vst [vmem:[%s2322_s4 + $0x40] sm:$0xff] %v1819_v27   ;;  %1959 = vst [vmem:[%s2322_s4 + $0xc0] sm:$0xff] %v1899_v28  }
 0x164   : > { %v1068_v35 = vmul.f32 0.2, %v804_v29  ;;  %v1100_v36 = vmul.f32 0.2, %v932_v30  ;;  %v807_v37 = vadd.f32 %v2312_v17, %v806_v33  ;;  %v935_v38 = vadd.f32 %v2312_v17, %v934_v34  ;;  %v808_v39 = vpop.f32.mrb[39].mxu0  ;;  %v936_v40 = vpop.f32.mrb[39].mxu1 }
 0x165   : > { %vm1004_vm4 = vcmp.ge.f32.partialorder %v804_v29, 0.0  ;;  %vm1036_vm5 = vcmp.ge.f32.partialorder %v932_v30, 0.0 }
 0x166   : > { %vm1005_vm6 = vcmp.ge.f32.partialorder %v807_v37, 0.0  ;;  %v1069_v41 = vmul.f32 0.2, %v807_v37  ;;  %vm1037_vm7 = vcmp.ge.f32.partialorder %v935_v38, 0.0  ;;  %v1101_v42 = vmul.f32 0.2, %v935_v38 }
 0x167   : > { %v1132_v43 = vsel %vm1004_vm4, %v804_v29, %v1068_v35  ;;  %v1164_v44 = vsel %vm1036_vm5, %v932_v30, %v1100_v36 }
 0x168   : > { %v1133_v45 = vsel %vm1005_vm6, %v807_v37, %v1069_v41  ;;  %v1165_v46 = vsel %vm1037_vm7, %v935_v38, %v1101_v42 }
 0x169   : > { %v811_v47 = vpop.f32.mrb[40].mxu0  ;;  %v939_v48 = vpop.f32.mrb[40].mxu1  ;;  %v1824_v49 = vpack.c.bf16 %v1133_v45, %v1132_v43  ;;  %v1904_v50 = vpack.c.bf16 %v1165_v46, %v1164_v44 }
 0x16a   : > { %v812_v51 = vadd.f32 %v2312_v17, %v811_v47  ;;  %v940_v52 = vadd.f32 %v2312_v17, %v939_v48  ;;  %v813_v53 = vpop.f32.mrb[41].mxu0  ;;  %v941_v54 = vpop.f32.mrb[41].mxu1 }
 0x16b   : > { %v814_v55 = vpop.f32.mrb[42].mxu0  ;;  %v942_v56 = vpop.f32.mrb[42].mxu1  ;;  %1944 = vst [vmem:[%s2322_s4 + $0x48] sm:$0xff] %v1824_v49   ;;  %1960 = vst [vmem:[%s2322_s4 + $0xc8] sm:$0xff] %v1904_v50  }
 0x16c   : > { %v1070_v57 = vmul.f32 0.2, %v812_v51  ;;  %v1102_v58 = vmul.f32 0.2, %v940_v52  ;;  %v815_v59 = vadd.f32 %v2312_v17, %v814_v55  ;;  %v943_v60 = vadd.f32 %v2312_v17, %v942_v56  ;;  %v816_v61 = vpop.f32.mrb[43].mxu0  ;;  %v944_v62 = vpop.f32.mrb[43].mxu1 }
 0x16d   : > { %vm1006_vm8 = vcmp.ge.f32.partialorder %v812_v51, 0.0  ;;  %vm1038_vm9 = vcmp.ge.f32.partialorder %v940_v52, 0.0 }
 0x16e   : > { %vm1007_vm10 = vcmp.ge.f32.partialorder %v815_v59, 0.0  ;;  %v1071_v63 = vmul.f32 0.2, %v815_v59  ;;  %vm1039_vm11 = vcmp.ge.f32.partialorder %v943_v60, 0.0  ;;  %v1103_v0 = vmul.f32 0.2, %v943_v60 }
 0x16f   : > { %v1134_v1 = vsel %vm1006_vm8, %v812_v51, %v1070_v57  ;;  %v1166_v2 = vsel %vm1038_vm9, %v940_v52, %v1102_v58 }
 0x170   : > { %v1135_v3 = vsel %vm1007_vm10, %v815_v59, %v1071_v63  ;;  %v1167_v4 = vsel %vm1039_vm11, %v943_v60, %v1103_v0 }
 0x171   : > { %v819_v5 = vpop.f32.mrb[44].mxu0  ;;  %v947_v6 = vpop.f32.mrb[44].mxu1  ;;  %v1829_v7 = vpack.c.bf16 %v1135_v3, %v1134_v1  ;;  %v1909_v8 = vpack.c.bf16 %v1167_v4, %v1166_v2 }
 0x172   : > { %v820_v9 = vadd.f32 %v2312_v17, %v819_v5  ;;  %v948_v10 = vadd.f32 %v2312_v17, %v947_v6  ;;  %v821_v11 = vpop.f32.mrb[45].mxu0  ;;  %v949_v12 = vpop.f32.mrb[45].mxu1 }
 0x173   : > { %v822_v13 = vpop.f32.mrb[46].mxu0  ;;  %v950_v14 = vpop.f32.mrb[46].mxu1  ;;  %1945 = vst [vmem:[%s2322_s4 + $0x50] sm:$0xff] %v1829_v7   ;;  %1961 = vst [vmem:[%s2322_s4 + $0xd0] sm:$0xff] %v1909_v8  }
 0x174   : > { %v1072_v15 = vmul.f32 0.2, %v820_v9  ;;  %v1104_v16 = vmul.f32 0.2, %v948_v10  ;;  %v823_v18 = vadd.f32 %v2312_v17, %v822_v13  ;;  %v951_v19 = vadd.f32 %v2312_v17, %v950_v14  ;;  %v824_v20 = vpop.f32.mrb[47].mxu0  ;;  %v952_v21 = vpop.f32.mrb[47].mxu1 }
 0x175   : > { %vm1008_vm12 = vcmp.ge.f32.partialorder %v820_v9, 0.0  ;;  %vm1040_vm13 = vcmp.ge.f32.partialorder %v948_v10, 0.0 }
 0x176   : > { %vm1009_vm14 = vcmp.ge.f32.partialorder %v823_v18, 0.0  ;;  %v1073_v22 = vmul.f32 0.2, %v823_v18  ;;  %vm1041_vm15 = vcmp.ge.f32.partialorder %v951_v19, 0.0  ;;  %v1105_v23 = vmul.f32 0.2, %v951_v19 }
 0x177   : > { %v1136_v24 = vsel %vm1008_vm12, %v820_v9, %v1072_v15  ;;  %v1168_v25 = vsel %vm1040_vm13, %v948_v10, %v1104_v16 }
 0x178   : > { %v1137_v26 = vsel %vm1009_vm14, %v823_v18, %v1073_v22  ;;  %v1169_v27 = vsel %vm1041_vm15, %v951_v19, %v1105_v23 }
 0x179   : > { %v827_v28 = vpop.f32.mrb[48].mxu0  ;;  %v955_v29 = vpop.f32.mrb[48].mxu1  ;;  %v1834_v30 = vpack.c.bf16 %v1137_v26, %v1136_v24  ;;  %v1914_v31 = vpack.c.bf16 %v1169_v27, %v1168_v25 }
 0x17a   : > { %v828_v32 = vadd.f32 %v2312_v17, %v827_v28  ;;  %v956_v33 = vadd.f32 %v2312_v17, %v955_v29  ;;  %v829_v34 = vpop.f32.mrb[49].mxu0  ;;  %v957_v35 = vpop.f32.mrb[49].mxu1 }
 0x17b   : > { %v830_v36 = vpop.f32.mrb[50].mxu0  ;;  %v958_v37 = vpop.f32.mrb[50].mxu1  ;;  %1946 = vst [vmem:[%s2322_s4 + $0x58] sm:$0xff] %v1834_v30   ;;  %1962 = vst [vmem:[%s2322_s4 + $0xd8] sm:$0xff] %v1914_v31  }
 0x17c   : > { %v1074_v38 = vmul.f32 0.2, %v828_v32  ;;  %v1106_v39 = vmul.f32 0.2, %v956_v33  ;;  %v831_v40 = vadd.f32 %v2312_v17, %v830_v36  ;;  %v959_v41 = vadd.f32 %v2312_v17, %v958_v37  ;;  %v832_v42 = vpop.f32.mrb[51].mxu0  ;;  %v960_v43 = vpop.f32.mrb[51].mxu1 }
 0x17d   : > { %vm1010_vm0 = vcmp.ge.f32.partialorder %v828_v32, 0.0  ;;  %vm1042_vm1 = vcmp.ge.f32.partialorder %v956_v33, 0.0 }
 0x17e   : > { %vm1011_vm2 = vcmp.ge.f32.partialorder %v831_v40, 0.0  ;;  %v1075_v44 = vmul.f32 0.2, %v831_v40  ;;  %vm1043_vm3 = vcmp.ge.f32.partialorder %v959_v41, 0.0  ;;  %v1107_v45 = vmul.f32 0.2, %v959_v41 }
 0x17f   : > { %v1138_v46 = vsel %vm1010_vm0, %v828_v32, %v1074_v38  ;;  %v1170_v47 = vsel %vm1042_vm1, %v956_v33, %v1106_v39 }
 0x180   : > { %v1139_v48 = vsel %vm1011_vm2, %v831_v40, %v1075_v44  ;;  %v1171_v49 = vsel %vm1043_vm3, %v959_v41, %v1107_v45 }
 0x181   : > { %v835_v50 = vpop.f32.mrb[52].mxu0  ;;  %v963_v51 = vpop.f32.mrb[52].mxu1  ;;  %v1839_v52 = vpack.c.bf16 %v1139_v48, %v1138_v46  ;;  %v1919_v53 = vpack.c.bf16 %v1171_v49, %v1170_v47 }
 0x182   : > { %v836_v54 = vadd.f32 %v2312_v17, %v835_v50  ;;  %v964_v55 = vadd.f32 %v2312_v17, %v963_v51  ;;  %v837_v56 = vpop.f32.mrb[53].mxu0  ;;  %v965_v57 = vpop.f32.mrb[53].mxu1 }
 0x183   : > { %v838_v58 = vpop.f32.mrb[54].mxu0  ;;  %v966_v59 = vpop.f32.mrb[54].mxu1  ;;  %1947 = vst [vmem:[%s2322_s4 + $0x60] sm:$0xff] %v1839_v52   ;;  %1963 = vst [vmem:[%s2322_s4 + $0xe0] sm:$0xff] %v1919_v53  }
 0x184   : > { %v1076_v60 = vmul.f32 0.2, %v836_v54  ;;  %v1108_v61 = vmul.f32 0.2, %v964_v55  ;;  %v839_v62 = vadd.f32 %v2312_v17, %v838_v58  ;;  %v967_v63 = vadd.f32 %v2312_v17, %v966_v59  ;;  %v840_v0 = vpop.f32.mrb[55].mxu0  ;;  %v968_v1 = vpop.f32.mrb[55].mxu1 }
 0x185   : > { %vm1012_vm4 = vcmp.ge.f32.partialorder %v836_v54, 0.0  ;;  %vm1044_vm5 = vcmp.ge.f32.partialorder %v964_v55, 0.0 }
 0x186   : > { %vm1013_vm6 = vcmp.ge.f32.partialorder %v839_v62, 0.0  ;;  %v1077_v2 = vmul.f32 0.2, %v839_v62  ;;  %vm1045_vm7 = vcmp.ge.f32.partialorder %v967_v63, 0.0  ;;  %v1109_v3 = vmul.f32 0.2, %v967_v63 }
 0x187   : > { %v1140_v4 = vsel %vm1012_vm4, %v836_v54, %v1076_v60  ;;  %v1172_v5 = vsel %vm1044_vm5, %v964_v55, %v1108_v61 }
 0x188   : > { %v1141_v6 = vsel %vm1013_vm6, %v839_v62, %v1077_v2  ;;  %v1173_v7 = vsel %vm1045_vm7, %v967_v63, %v1109_v3 }
 0x189   : > { %v843_v8 = vpop.f32.mrb[56].mxu0  ;;  %v971_v9 = vpop.f32.mrb[56].mxu1  ;;  %v1844_v10 = vpack.c.bf16 %v1141_v6, %v1140_v4  ;;  %v1924_v11 = vpack.c.bf16 %v1173_v7, %v1172_v5 }
 0x18a   : > { %v844_v12 = vadd.f32 %v2312_v17, %v843_v8  ;;  %v972_v13 = vadd.f32 %v2312_v17, %v971_v9  ;;  %v845_v14 = vpop.f32.mrb[57].mxu0  ;;  %v973_v15 = vpop.f32.mrb[57].mxu1 }
 0x18b   : > { %v846_v16 = vpop.f32.mrb[58].mxu0  ;;  %v974_v18 = vpop.f32.mrb[58].mxu1  ;;  %1948 = vst [vmem:[%s2322_s4 + $0x68] sm:$0xff] %v1844_v10   ;;  %1964 = vst [vmem:[%s2322_s4 + $0xe8] sm:$0xff] %v1924_v11  }
 0x18c   : > { %v1078_v19 = vmul.f32 0.2, %v844_v12  ;;  %v1110_v20 = vmul.f32 0.2, %v972_v13  ;;  %v847_v21 = vadd.f32 %v2312_v17, %v846_v16  ;;  %v975_v22 = vadd.f32 %v2312_v17, %v974_v18  ;;  %v848_v23 = vpop.f32.mrb[59].mxu0  ;;  %v976_v24 = vpop.f32.mrb[59].mxu1 }
 0x18d   : > { %vm1014_vm8 = vcmp.ge.f32.partialorder %v844_v12, 0.0  ;;  %vm1046_vm9 = vcmp.ge.f32.partialorder %v972_v13, 0.0 }
 0x18e   : > { %vm1015_vm10 = vcmp.ge.f32.partialorder %v847_v21, 0.0  ;;  %v1079_v25 = vmul.f32 0.2, %v847_v21  ;;  %vm1047_vm11 = vcmp.ge.f32.partialorder %v975_v22, 0.0  ;;  %v1111_v26 = vmul.f32 0.2, %v975_v22 }
 0x18f   : > { %v1142_v27 = vsel %vm1014_vm8, %v844_v12, %v1078_v19  ;;  %v1174_v28 = vsel %vm1046_vm9, %v972_v13, %v1110_v20 }
 0x190   : > { %v1143_v29 = vsel %vm1015_vm10, %v847_v21, %v1079_v25  ;;  %v1175_v30 = vsel %vm1047_vm11, %v975_v22, %v1111_v26 }
 0x191   : > { %v851_v31 = vpop.f32.mrb[60].mxu0  ;;  %v979_v32 = vpop.f32.mrb[60].mxu1  ;;  %v1849_v33 = vpack.c.bf16 %v1143_v29, %v1142_v27  ;;  %v1929_v34 = vpack.c.bf16 %v1175_v30, %v1174_v28 }
 0x192   : > { %v852_v35 = vadd.f32 %v2312_v17, %v851_v31  ;;  %v980_v36 = vadd.f32 %v2312_v17, %v979_v32  ;;  %v853_v37 = vpop.f32.mrb[61].mxu0  ;;  %v981_v38 = vpop.f32.mrb[61].mxu1 }
 0x193   : > { %v854_v39 = vpop.f32.mrb[62].mxu0  ;;  %v982_v40 = vpop.f32.mrb[62].mxu1  ;;  %1949 = vst [vmem:[%s2322_s4 + $0x70] sm:$0xff] %v1849_v33   ;;  %1965 = vst [vmem:[%s2322_s4 + $0xf0] sm:$0xff] %v1929_v34  }
 0x194   : > { %v1080_v41 = vmul.f32 0.2, %v852_v35  ;;  %v1112_v42 = vmul.f32 0.2, %v980_v36  ;;  %v855_v43 = vadd.f32 %v2312_v17, %v854_v39  ;;  %v983_v44 = vadd.f32 %v2312_v17, %v982_v40  ;;  %v856_v45 = vpop.f32.mrb[63].mxu0  ;;  %v984_v46 = vpop.f32.mrb[63].mxu1 }
 0x195   : > { %vm1016_vm12 = vcmp.ge.f32.partialorder %v852_v35, 0.0  ;;  %vm1048_vm13 = vcmp.ge.f32.partialorder %v980_v36, 0.0 }
 0x196   : > { %vm1017_vm14 = vcmp.ge.f32.partialorder %v855_v43, 0.0  ;;  %v1081_v47 = vmul.f32 0.2, %v855_v43  ;;  %vm1049_vm15 = vcmp.ge.f32.partialorder %v983_v44, 0.0  ;;  %v1113_v48 = vmul.f32 0.2, %v983_v44 }
 0x197   : > { %v1144_v49 = vsel %vm1016_vm12, %v852_v35, %v1080_v41  ;;  %v1176_v50 = vsel %vm1048_vm13, %v980_v36, %v1112_v42 }
 0x198   : > { %v1145_v51 = vsel %vm1017_vm14, %v855_v43, %v1081_v47  ;;  %v1177_v52 = vsel %vm1049_vm15, %v983_v44, %v1113_v48 }
 0x199   : > { %v1854_v53 = vpack.c.bf16 %v1145_v51, %v1144_v49  ;;  %v1934_v54 = vpack.c.bf16 %v1177_v52, %v1176_v50 }
 0x19b   : > { %1950 = vst [vmem:[%s2322_s4 + $0x78] sm:$0xff] %v1854_v53   ;;  %1966 = vst [vmem:[%s2322_s4 + $0xf8] sm:$0xff] %v1934_v54  }
 0x19c PF: > { %s13_s12 = sadd.s32 1, %s2126_s12  }
 0x19d   : > { %p10_p4 = scmp.ge.s32.totalorder %s13_s12, 6  }
 0x19f   :  { %12 = sbr.rel (!%p10_p4) target bundleno = 1 (0x1), region = 62 }

// kernel: patch_discriminator1_forward.7
= control target key start
LH: loop header
LB: loop body
LE: loop exit
PB: predicated region body
PF: predicated region fallthrough
CT: control target
= control target key end

     0   :  { %s1997_s1 = inlined_call_operand.vmem [shape: bf16[128,128], index: 1, kind: input, shape index: {}]   ;;  %s1998_s0 = inlined_call_operand.vmem [shape: bf16[512,128], index: 0, kind: input, shape index: {}]   ;;  %s1999_s2 = inlined_call_operand.vmem [shape: f32[1,128], index: 2, kind: input, shape index: {}]   ;;  %s2000_s3 = inlined_call_operand.vmem [shape: bf16[512,128], index: 3, kind: output, shape index: {}]  }
   0x1   :  { %v1643_v0 = vld [vmem:[%s1997_s1] sm:$0xff]   ;;  %v1644_v1 = vld [vmem:[%s1997_s1 + $0x8] sm:$0xff]   ;;  %v1645_v2 = vld [vmem:[%s1997_s1 + $0x10] sm:$0xff]  }
   0x2   :  { %1547 = vmatprep.subr.bf16.mxu0 %v1643_v0  ;;  %1627 = vmatprep.subr.bf16.mxu1 %v1643_v0  ;;  %v1646_v3 = vld [vmem:[%s1997_s1 + $0x18] sm:$0xff]   ;;  %v1651_v4 = vld [vmem:[%s1998_s0] sm:$0xff]   ;;  %v1648_v7 = vld [vmem:[%s1997_s1 + $0x28] sm:$0xff]  }
   0x3   :  { %1548 = vmatpush3.bf16.msra.mxu0 %v1643_v0  ;;  %1635 = vmatpush3.bf16.msra.mxu1 %v1643_v0  ;;  %v1652_v5 = vld [vmem:[%s1998_s0 + $0x80] sm:$0xff]   ;;  %v1649_v8 = vld [vmem:[%s1997_s1 + $0x30] sm:$0xff]   ;;  %v1650_v9 = vld [vmem:[%s1997_s1 + $0x38] sm:$0xff]  }
   0x4   :  { %1549 = vmatprep.subr.bf16.mxu0 %v1644_v1  ;;  %1628 = vmatprep.subr.bf16.mxu1 %v1644_v1  ;;  %v1647_v6 = vld [vmem:[%s1997_s1 + $0x20] sm:$0xff]   ;;  %v1653_v10 = vld [vmem:[%s1998_s0 + $0x8] sm:$0xff]   ;;  %v1655_v12 = vld [vmem:[%s1998_s0 + $0x10] sm:$0xff]  }
   0x5   :  { %1563 = vmatprep.mubr.bf16.mxu0 %v1651_v4  ;;  %1595 = vmatprep.mubr.bf16.mxu1 %v1652_v5  ;;  %v1654_v11 = vld [vmem:[%s1998_s0 + $0x88] sm:$0xff]   ;;  %v1656_v13 = vld [vmem:[%s1998_s0 + $0x90] sm:$0xff]   ;;  %v1657_v14 = vld [vmem:[%s1998_s0 + $0x18] sm:$0xff]  }
   0x6   :  { %v1658_v15 = vld [vmem:[%s1998_s0 + $0x98] sm:$0xff]   ;;  %v1659_v16 = vld [vmem:[%s1998_s0 + $0x20] sm:$0xff]   ;;  %v1661_v18 = vld [vmem:[%s1998_s0 + $0x28] sm:$0xff]  }
   0x7   :  { %1550 = vmatpush3.bf16.msra.mxu0 %v1644_v1  ;;  %1636 = vmatpush3.bf16.msra.mxu1 %v1644_v1  ;;  %v1660_v17 = vld [vmem:[%s1998_s0 + $0xa0] sm:$0xff]   ;;  %v1662_v19 = vld [vmem:[%s1998_s0 + $0xa8] sm:$0xff]   ;;  %v1663_v20 = vld [vmem:[%s1998_s0 + $0x30] sm:$0xff]  }
   0x8   :  { %1551 = vmatprep.subr.bf16.mxu0 %v1645_v2  ;;  %1629 = vmatprep.subr.bf16.mxu1 %v1645_v2  ;;  %v1664_v21 = vld [vmem:[%s1998_s0 + $0xb0] sm:$0xff]   ;;  %v1665_v22 = vld [vmem:[%s1998_s0 + $0x38] sm:$0xff]   ;;  %v1667_v24 = vld [vmem:[%s1998_s0 + $0x40] sm:$0xff]  }
   0x9   :  { %v1666_v23 = vld [vmem:[%s1998_s0 + $0xb8] sm:$0xff]   ;;  %v1668_v25 = vld [vmem:[%s1998_s0 + $0xc0] sm:$0xff]   ;;  %v1669_v26 = vld [vmem:[%s1998_s0 + $0x48] sm:$0xff]  }
   0xa   :  { %v1670_v27 = vld [vmem:[%s1998_s0 + $0xc8] sm:$0xff]   ;;  %v1671_v28 = vld [vmem:[%s1998_s0 + $0x50] sm:$0xff]   ;;  %v1673_v30 = vld [vmem:[%s1998_s0 + $0x58] sm:$0xff]  }
   0xb   :  { %1552 = vmatpush3.bf16.msra.mxu0 %v1645_v2  ;;  %1637 = vmatpush3.bf16.msra.mxu1 %v1645_v2  ;;  %v1672_v29 = vld [vmem:[%s1998_s0 + $0xd0] sm:$0xff]   ;;  %v1674_v31 = vld [vmem:[%s1998_s0 + $0xd8] sm:$0xff]   ;;  %v1675_v32 = vld [vmem:[%s1998_s0 + $0x60] sm:$0xff]  }
   0xc   :  { %1553 = vmatprep.subr.bf16.mxu0 %v1646_v3  ;;  %1630 = vmatprep.subr.bf16.mxu1 %v1646_v3  ;;  %v1676_v33 = vld [vmem:[%s1998_s0 + $0xe0] sm:$0xff]   ;;  %v1677_v34 = vld [vmem:[%s1998_s0 + $0x68] sm:$0xff]   ;;  %v1679_v36 = vld [vmem:[%s1998_s0 + $0x70] sm:$0xff]  }
   0xd   :  { %v1678_v35 = vld [vmem:[%s1998_s0 + $0xe8] sm:$0xff]   ;;  %v1680_v37 = vld [vmem:[%s1998_s0 + $0xf0] sm:$0xff]   ;;  %v1681_v38 = vld [vmem:[%s1998_s0 + $0x78] sm:$0xff]  }
   0xe   :  { %v1682_v39 = vld [vmem:[%s1998_s0 + $0xf8] sm:$0xff]   ;;  %v1826_v40 = vld [vmem:[%s1999_s2] ss:$0 sm:$0xff] }
   0xf   :  { %1554 = vmatpush3.bf16.msra.mxu0 %v1646_v3  ;;  %1638 = vmatpush3.bf16.msra.mxu1 %v1646_v3 }
  0x10   :  { %1555 = vmatprep.subr.bf16.mxu0 %v1647_v6  ;;  %1631 = vmatprep.subr.bf16.mxu1 %v1647_v6 }
  0x13   :  { %1556 = vmatpush3.bf16.msra.mxu0 %v1647_v6  ;;  %1639 = vmatpush3.bf16.msra.mxu1 %v1647_v6 }
  0x14   :  { %1557 = vmatprep.subr.bf16.mxu0 %v1648_v7  ;;  %1632 = vmatprep.subr.bf16.mxu1 %v1648_v7 }
  0x17   :  { %1558 = vmatpush3.bf16.msra.mxu0 %v1648_v7  ;;  %1640 = vmatpush3.bf16.msra.mxu1 %v1648_v7 }
  0x18   :  { %1559 = vmatprep.subr.bf16.mxu0 %v1649_v8  ;;  %1633 = vmatprep.subr.bf16.mxu1 %v1649_v8 }
  0x1b   :  { %1560 = vmatpush3.bf16.msra.mxu0 %v1649_v8  ;;  %1641 = vmatpush3.bf16.msra.mxu1 %v1649_v8 }
  0x1c   :  { %1561 = vmatprep.subr.bf16.mxu0 %v1650_v9  ;;  %1634 = vmatprep.subr.bf16.mxu1 %v1650_v9 }
  0x1f   :  { %1562 = vmatpush3.bf16.msra.mxu0 %v1650_v9  ;;  %1642 = vmatpush3.bf16.msra.mxu1 %v1650_v9 }
  0x22   :  { %1564 = vmatmul.mubr.bf16.vlgmr.msra.gmra.mrb[0].mxu0 %v1653_v10  ;;  %1596 = vmatmul.mubr.bf16.vlgmr.msra.gmra.mrb[0].mxu1 %v1654_v11 }
  0x23   :  { %1567 = vmatprep.mubr.bf16.mxu0 %v1655_v12  ;;  %1599 = vmatprep.mubr.bf16.mxu1 %v1656_v13 }
  0x2a   :  { %1568 = vmatmul.mubr.bf16.gmra.mrb[4].mxu0 %v1657_v14  ;;  %1600 = vmatmul.mubr.bf16.gmra.mrb[4].mxu1 %v1658_v15 }
  0x2b   :  { %1571 = vmatprep.mubr.bf16.mxu0 %v1659_v16  ;;  %1603 = vmatprep.mubr.bf16.mxu1 %v1660_v17 }
  0x32   :  { %1572 = vmatmul.mubr.bf16.gmra.mrb[8].mxu0 %v1661_v18  ;;  %1604 = vmatmul.mubr.bf16.gmra.mrb[8].mxu1 %v1662_v19 }
  0x33   :  { %1575 = vmatprep.mubr.bf16.mxu0 %v1663_v20  ;;  %1607 = vmatprep.mubr.bf16.mxu1 %v1664_v21 }
  0x3a   :  { %1576 = vmatmul.mubr.bf16.gmra.mrb[12].mxu0 %v1665_v22  ;;  %1608 = vmatmul.mubr.bf16.gmra.mrb[12].mxu1 %v1666_v23 }
  0x3b   :  { %1579 = vmatprep.mubr.bf16.mxu0 %v1667_v24  ;;  %1611 = vmatprep.mubr.bf16.mxu1 %v1668_v25 }
  0x42   :  { %1580 = vmatmul.mubr.bf16.gmra.mrb[16].mxu0 %v1669_v26  ;;  %1612 = vmatmul.mubr.bf16.gmra.mrb[16].mxu1 %v1670_v27 }
  0x43   :  { %1583 = vmatprep.mubr.bf16.mxu0 %v1671_v28  ;;  %1615 = vmatprep.mubr.bf16.mxu1 %v1672_v29 }
  0x4a   :  { %1584 = vmatmul.mubr.bf16.gmra.mrb[20].mxu0 %v1673_v30  ;;  %1616 = vmatmul.mubr.bf16.gmra.mrb[20].mxu1 %v1674_v31 }
  0x4b   :  { %1587 = vmatprep.mubr.bf16.mxu0 %v1675_v32  ;;  %1619 = vmatprep.mubr.bf16.mxu1 %v1676_v33 }
  0x52   :  { %1588 = vmatmul.mubr.bf16.gmra.mrb[24].mxu0 %v1677_v34  ;;  %1620 = vmatmul.mubr.bf16.gmra.mrb[24].mxu1 %v1678_v35 }
  0x53   :  { %1591 = vmatprep.mubr.bf16.mxu0 %v1679_v36  ;;  %1623 = vmatprep.mubr.bf16.mxu1 %v1680_v37 }
  0x5a   :  { %1592 = vmatmul.mubr.bf16.gmra.mrb[28].mxu0 %v1681_v38  ;;  %1624 = vmatmul.mubr.bf16.gmra.mrb[28].mxu1 %v1682_v39 }
  0xf5   :  { %v1565_v41 = vpop.f32.mrb[0].mxu0  ;;  %v1597_v42 = vpop.f32.mrb[0].mxu1 }
  0xf6   :  { %v385_v43 = vadd.f32 %v1565_v41, %v1826_v40  ;;  %v513_v44 = vadd.f32 %v1597_v42, %v1826_v40  ;;  %v376_v45 = vpop.f32.mrb[1].mxu0  ;;  %v504_v46 = vpop.f32.mrb[1].mxu1 }
  0xf7   :  { %v377_v47 = vadd.f32 %v1826_v40, %v376_v45  ;;  %v505_v48 = vadd.f32 %v1826_v40, %v504_v46  ;;  %v1566_v49 = vpop.f32.mrb[2].mxu0  ;;  %v1598_v50 = vpop.f32.mrb[2].mxu1 }
  0xf8   :  { %vm633_vm0 = vcmp.ge.f32.partialorder %v385_v43, 0.0  ;;  %v697_v51 = vmul.f32 0.2, %v385_v43  ;;  %vm665_vm1 = vcmp.ge.f32.partialorder %v513_v44, 0.0  ;;  %v729_v52 = vmul.f32 0.2, %v513_v44 }
  0xf9   :  { %vm631_vm2 = vcmp.ge.f32.partialorder %v377_v47, 0.0  ;;  %v695_v53 = vmul.f32 0.2, %v377_v47  ;;  %vm663_vm3 = vcmp.ge.f32.partialorder %v505_v48, 0.0  ;;  %v727_v54 = vmul.f32 0.2, %v505_v48 }
  0xfa   :  { %v388_v55 = vadd.f32 %v1566_v49, %v1826_v40  ;;  %v516_v56 = vadd.f32 %v1598_v50, %v1826_v40  ;;  %v379_v57 = vpop.f32.mrb[3].mxu0  ;;  %v507_v58 = vpop.f32.mrb[3].mxu1  ;;  %v761_v59 = vsel %vm633_vm0, %v385_v43, %v697_v51  ;;  %v793_v60 = vsel %vm665_vm1, %v513_v44, %v729_v52 }
  0xfb   :  { %v380_v61 = vadd.f32 %v1826_v40, %v379_v57  ;;  %v508_v62 = vadd.f32 %v1826_v40, %v507_v58  ;;  %v759_v3 = vsel %vm631_vm2, %v377_v47, %v695_v53  ;;  %v791_v4 = vsel %vm663_vm3, %v505_v48, %v727_v54 }
  0xfc   :  { %vm634_vm4 = vcmp.ge.f32.partialorder %v388_v55, 0.0  ;;  %v698_v63 = vmul.f32 0.2, %v388_v55  ;;  %vm666_vm5 = vcmp.ge.f32.partialorder %v516_v56, 0.0  ;;  %v730_v0 = vmul.f32 0.2, %v516_v56 }
  0xfd   :  { %vm632_vm6 = vcmp.ge.f32.partialorder %v380_v61, 0.0  ;;  %v696_v1 = vmul.f32 0.2, %v380_v61  ;;  %vm664_vm7 = vcmp.ge.f32.partialorder %v508_v62, 0.0  ;;  %v728_v2 = vmul.f32 0.2, %v508_v62 }
  0xfe   :  { %v762_v5 = vsel %vm634_vm4, %v388_v55, %v698_v63  ;;  %v794_v6 = vsel %vm666_vm5, %v516_v56, %v730_v0  ;;  %v1569_v7 = vpop.f32.mrb[4].mxu0  ;;  %v1601_v8 = vpop.f32.mrb[4].mxu1 }
  0xff   :  { %v1324_v9 = vpack.c.bf16 %v762_v5, %v761_v59  ;;  %v1404_v10 = vpack.c.bf16 %v794_v6, %v793_v60  ;;  %v760_v11 = vsel %vm632_vm6, %v380_v61, %v696_v1  ;;  %v792_v12 = vsel %vm664_vm7, %v508_v62, %v728_v2  ;;  %v392_v13 = vpop.f32.mrb[5].mxu0  ;;  %v520_v14 = vpop.f32.mrb[5].mxu1 }
 0x100   :  { %v1319_v15 = vpack.c.bf16 %v760_v11, %v759_v3  ;;  %v1399_v16 = vpack.c.bf16 %v792_v12, %v791_v4  ;;  %v401_v17 = vadd.f32 %v1569_v7, %v1826_v40  ;;  %v529_v18 = vadd.f32 %v1601_v8, %v1826_v40  ;;  %v1570_v19 = vpop.f32.mrb[6].mxu0  ;;  %v1602_v20 = vpop.f32.mrb[6].mxu1 }
 0x101   :  { %1476 = vst [vmem:[%s2000_s3 + $0x8] sm:$0xff] %v1324_v9   ;;  %1492 = vst [vmem:[%s2000_s3 + $0x88] sm:$0xff] %v1404_v10   ;;  %v393_v21 = vadd.f32 %v1826_v40, %v392_v13  ;;  %v521_v22 = vadd.f32 %v1826_v40, %v520_v14  ;;  %v404_v23 = vadd.f32 %v1570_v19, %v1826_v40  ;;  %v395_v25 = vpop.f32.mrb[7].mxu0  ;;  %v523_v26 = vpop.f32.mrb[7].mxu1 }
 0x102   :  { %v532_v24 = vadd.f32 %v1602_v20, %v1826_v40  ;;  %1320 = vst [vmem:[%s2000_s3] sm:$0xff] %v1319_v15   ;;  %1491 = vst [vmem:[%s2000_s3 + $0x80] sm:$0xff] %v1399_v16   ;;  %vm637_vm8 = vcmp.ge.f32.partialorder %v401_v17, 0.0  ;;  %v701_v27 = vmul.f32 0.2, %v401_v17  ;;  %vm669_vm9 = vcmp.ge.f32.partialorder %v529_v18, 0.0 }
 0x103   :  { %v733_v28 = vmul.f32 0.2, %v529_v18  ;;  %vm635_vm10 = vcmp.ge.f32.partialorder %v393_v21, 0.0  ;;  %v699_v29 = vmul.f32 0.2, %v393_v21  ;;  %vm667_vm11 = vcmp.ge.f32.partialorder %v521_v22, 0.0 }
 0x104   :  { %v731_v30 = vmul.f32 0.2, %v521_v22  ;;  %v765_v31 = vsel %vm637_vm8, %v401_v17, %v701_v27  ;;  %vm638_vm12 = vcmp.ge.f32.partialorder %v404_v23, 0.0  ;;  %v702_v33 = vmul.f32 0.2, %v404_v23 }
 0x105   :  { %v797_v32 = vsel %vm669_vm9, %v529_v18, %v733_v28  ;;  %v763_v34 = vsel %vm635_vm10, %v393_v21, %v699_v29  ;;  %vm670_vm13 = vcmp.ge.f32.partialorder %v532_v24, 0.0  ;;  %v734_v36 = vmul.f32 0.2, %v532_v24  ;;  %v1573_v37 = vpop.f32.mrb[8].mxu0  ;;  %v1605_v38 = vpop.f32.mrb[8].mxu1 }
 0x106   :  { %v795_v35 = vsel %vm667_vm11, %v521_v22, %v731_v30  ;;  %v766_v39 = vsel %vm638_vm12, %v404_v23, %v702_v33  ;;  %v396_v41 = vadd.f32 %v1826_v40, %v395_v25  ;;  %v524_v42 = vadd.f32 %v1826_v40, %v523_v26  ;;  %v408_v44 = vpop.f32.mrb[9].mxu0  ;;  %v536_v45 = vpop.f32.mrb[9].mxu1 }
 0x107   :  { %v417_v43 = vadd.f32 %v1573_v37, %v1826_v40  ;;  %v1334_v46 = vpack.c.bf16 %v766_v39, %v765_v31  ;;  %v798_v47 = vsel %vm670_vm13, %v532_v24, %v734_v36  ;;  %v545_v48 = vadd.f32 %v1605_v38, %v1826_v40  ;;  %v1574_v50 = vpop.f32.mrb[10].mxu0  ;;  %v1606_v51 = vpop.f32.mrb[10].mxu1 }
 0x108   :  { %v409_v49 = vadd.f32 %v1826_v40, %v408_v44  ;;  %v1414_v52 = vpack.c.bf16 %v798_v47, %v797_v32  ;;  %vm636_vm14 = vcmp.ge.f32.partialorder %v396_v41, 0.0  ;;  %v700_v53 = vmul.f32 0.2, %v396_v41  ;;  %v411_v54 = vpop.f32.mrb[11].mxu0  ;;  %v539_v55 = vpop.f32.mrb[11].mxu1 }
 0x109   :  { %vm668_vm15 = vcmp.ge.f32.partialorder %v524_v42, 0.0  ;;  %1478 = vst [vmem:[%s2000_s3 + $0x18] sm:$0xff] %v1334_v46   ;;  %v732_v56 = vmul.f32 0.2, %v524_v42  ;;  %vm641_vm0 = vcmp.ge.f32.partialorder %v417_v43, 0.0  ;;  %vm673_vm1 = vcmp.ge.f32.partialorder %v545_v48, 0.0 }
 0x10a   :  { %v705_v57 = vmul.f32 0.2, %v417_v43  ;;  %1494 = vst [vmem:[%s2000_s3 + $0x98] sm:$0xff] %v1414_v52   ;;  %v764_v58 = vsel %vm636_vm14, %v396_v41, %v700_v53  ;;  %v737_v59 = vmul.f32 0.2, %v545_v48  ;;  %vm639_vm2 = vcmp.ge.f32.partialorder %v409_v49, 0.0 }
 0x10b   :  { %v703_v60 = vmul.f32 0.2, %v409_v49  ;;  %v1329_v61 = vpack.c.bf16 %v764_v58, %v763_v34  ;;  %v796_v62 = vsel %vm668_vm15, %v524_v42, %v732_v56  ;;  %v537_v0 = vadd.f32 %v1826_v40, %v536_v45 }
 0x10c   :  { %v769_v63 = vsel %vm641_vm0, %v417_v43, %v705_v57  ;;  %v1409_v1 = vpack.c.bf16 %v796_v62, %v795_v35  ;;  %v801_v2 = vsel %vm673_vm1, %v545_v48, %v737_v59  ;;  %v420_v4 = vadd.f32 %v1574_v50, %v1826_v40 }
 0x10d   :  { %v767_v3 = vsel %vm639_vm2, %v409_v49, %v703_v60  ;;  %1477 = vst [vmem:[%s2000_s3 + $0x10] sm:$0xff] %v1329_v61   ;;  %vm671_vm3 = vcmp.ge.f32.partialorder %v537_v0, 0.0  ;;  %v735_v5 = vmul.f32 0.2, %v537_v0  ;;  %v548_v6 = vadd.f32 %v1606_v51, %v1826_v40  ;;  %v1577_v8 = vpop.f32.mrb[12].mxu0  ;;  %v1609_v9 = vpop.f32.mrb[12].mxu1 }
 0x10e   :  { %v412_v7 = vadd.f32 %v1826_v40, %v411_v54  ;;  %1493 = vst [vmem:[%s2000_s3 + $0x90] sm:$0xff] %v1409_v1   ;;  %vm642_vm4 = vcmp.ge.f32.partialorder %v420_v4, 0.0  ;;  %v706_v10 = vmul.f32 0.2, %v420_v4  ;;  %v540_v11 = vadd.f32 %v1826_v40, %v539_v55  ;;  %v424_v13 = vpop.f32.mrb[13].mxu0  ;;  %v552_v14 = vpop.f32.mrb[13].mxu1 }
 0x10f   :  { %v433_v12 = vadd.f32 %v1577_v8, %v1826_v40  ;;  %v799_v15 = vsel %vm671_vm3, %v537_v0, %v735_v5  ;;  %vm674_vm5 = vcmp.ge.f32.partialorder %v548_v6, 0.0  ;;  %v738_v16 = vmul.f32 0.2, %v548_v6  ;;  %v1578_v17 = vpop.f32.mrb[14].mxu0  ;;  %v1610_v18 = vpop.f32.mrb[14].mxu1 }
 0x110   :  { %vm640_vm6 = vcmp.ge.f32.partialorder %v412_v7, 0.0  ;;  %v770_v19 = vsel %vm642_vm4, %v420_v4, %v706_v10  ;;  %v704_v20 = vmul.f32 0.2, %v412_v7  ;;  %vm672_vm7 = vcmp.ge.f32.partialorder %v540_v11, 0.0  ;;  %v427_v22 = vpop.f32.mrb[15].mxu0  ;;  %v555_v26 = vpop.f32.mrb[15].mxu1 }
 0x111   :  { %v736_v21 = vmul.f32 0.2, %v540_v11  ;;  %v1344_v23 = vpack.c.bf16 %v770_v19, %v769_v63  ;;  %v802_v24 = vsel %vm674_vm5, %v548_v6, %v738_v16  ;;  %vm645_vm8 = vcmp.ge.f32.partialorder %v433_v12, 0.0 }
 0x112   :  { %v709_v25 = vmul.f32 0.2, %v433_v12  ;;  %v1424_v27 = vpack.c.bf16 %v802_v24, %v801_v2  ;;  %v768_v28 = vsel %vm640_vm6, %v412_v7, %v704_v20  ;;  %v561_v30 = vadd.f32 %v1609_v9, %v1826_v40 }
 0x113   :  { %v800_v29 = vsel %vm672_vm7, %v540_v11, %v736_v21  ;;  %1480 = vst [vmem:[%s2000_s3 + $0x28] sm:$0xff] %v1344_v23   ;;  %v1339_v31 = vpack.c.bf16 %v768_v28, %v767_v3  ;;  %v425_v34 = vadd.f32 %v1826_v40, %v424_v13  ;;  %v553_v36 = vadd.f32 %v1826_v40, %v552_v14 }
 0x114   :  { %v1419_v32 = vpack.c.bf16 %v800_v29, %v799_v15  ;;  %v773_v33 = vsel %vm645_vm8, %v433_v12, %v709_v25  ;;  %1496 = vst [vmem:[%s2000_s3 + $0xa8] sm:$0xff] %v1424_v27   ;;  %vm677_vm9 = vcmp.ge.f32.partialorder %v561_v30, 0.0  ;;  %v741_v35 = vmul.f32 0.2, %v561_v30 }
 0x115   :  { %v436_v37 = vadd.f32 %v1578_v17, %v1826_v40  ;;  %1479 = vst [vmem:[%s2000_s3 + $0x20] sm:$0xff] %v1339_v31   ;;  %vm643_vm10 = vcmp.ge.f32.partialorder %v425_v34, 0.0  ;;  %v707_v38 = vmul.f32 0.2, %v425_v34  ;;  %v564_v39 = vadd.f32 %v1610_v18, %v1826_v40  ;;  %v1581_v42 = vpop.f32.mrb[16].mxu0  ;;  %v1613_v43 = vpop.f32.mrb[16].mxu1 }
 0x116   :  { %1495 = vst [vmem:[%s2000_s3 + $0xa0] sm:$0xff] %v1419_v32   ;;  %v428_v41 = vadd.f32 %v1826_v40, %v427_v22  ;;  %v805_v44 = vsel %vm677_vm9, %v561_v30, %v741_v35  ;;  %vm675_vm11 = vcmp.ge.f32.partialorder %v553_v36, 0.0  ;;  %v739_v45 = vmul.f32 0.2, %v553_v36  ;;  %v440_v46 = vpop.f32.mrb[17].mxu0  ;;  %v568_v47 = vpop.f32.mrb[17].mxu1 }
 0x117   :  { %vm646_vm12 = vcmp.ge.f32.partialorder %v436_v37, 0.0  ;;  %v771_v48 = vsel %vm643_vm10, %v425_v34, %v707_v38  ;;  %v710_v49 = vmul.f32 0.2, %v436_v37  ;;  %vm678_vm13 = vcmp.ge.f32.partialorder %v564_v39, 0.0  ;;  %v1582_v51 = vpop.f32.mrb[18].mxu0  ;;  %v1614_v55 = vpop.f32.mrb[18].mxu1 }
 0x118   :  { %v742_v50 = vmul.f32 0.2, %v564_v39  ;;  %v803_v52 = vsel %vm675_vm11, %v553_v36, %v739_v45  ;;  %vm644_vm14 = vcmp.ge.f32.partialorder %v428_v41, 0.0  ;;  %v708_v53 = vmul.f32 0.2, %v428_v41  ;;  %v443_v56 = vpop.f32.mrb[19].mxu0 }
 0x119   :  { %v556_v54 = vadd.f32 %v1826_v40, %v555_v26  ;;  %v774_v57 = vsel %vm646_vm12, %v436_v37, %v710_v49  ;;  %v449_v59 = vadd.f32 %v1581_v42, %v1826_v40  ;;  %v577_v60 = vadd.f32 %v1613_v43, %v1826_v40  ;;  %v571_v61 = vpop.f32.mrb[19].mxu1 }
 0x11a   :  { %v806_v58 = vsel %vm678_vm13, %v564_v39, %v742_v50  ;;  %v1354_v62 = vpack.c.bf16 %v774_v57, %v773_v33  ;;  %v772_v0 = vsel %vm644_vm14, %v428_v41, %v708_v53  ;;  %v441_v5 = vadd.f32 %v1826_v40, %v440_v46 }
 0x11b   :  { %v1434_v63 = vpack.c.bf16 %v806_v58, %v805_v44  ;;  %vm676_vm15 = vcmp.ge.f32.partialorder %v556_v54, 0.0  ;;  %v1349_v1 = vpack.c.bf16 %v772_v0, %v771_v48  ;;  %v740_v2 = vmul.f32 0.2, %v556_v54 }
 0x11c   :  { %vm649_vm0 = vcmp.ge.f32.partialorder %v449_v59, 0.0  ;;  %v713_v3 = vmul.f32 0.2, %v449_v59  ;;  %1482 = vst [vmem:[%s2000_s3 + $0x38] sm:$0xff] %v1354_v62   ;;  %vm681_vm1 = vcmp.ge.f32.partialorder %v577_v60, 0.0  ;;  %v569_v6 = vadd.f32 %v1826_v40, %v568_v47 }
 0x11d   :  { %1498 = vst [vmem:[%s2000_s3 + $0xb8] sm:$0xff] %v1434_v63   ;;  %v745_v4 = vmul.f32 0.2, %v577_v60  ;;  %1481 = vst [vmem:[%s2000_s3 + $0x30] sm:$0xff] %v1349_v1   ;;  %v804_v7 = vsel %vm676_vm15, %v556_v54, %v740_v2  ;;  %v452_v9 = vadd.f32 %v1582_v51, %v1826_v40  ;;  %v580_v10 = vadd.f32 %v1614_v55, %v1826_v40  ;;  %v1585_v11 = vpop.f32.mrb[20].mxu0  ;;  %v1617_v12 = vpop.f32.mrb[20].mxu1 }
 0x11e   :  { %v777_v8 = vsel %vm649_vm0, %v449_v59, %v713_v3  ;;  %v1429_v13 = vpack.c.bf16 %v804_v7, %v803_v52  ;;  %vm647_vm2 = vcmp.ge.f32.partialorder %v441_v5, 0.0  ;;  %v711_v15 = vmul.f32 0.2, %v441_v5  ;;  %v456_v16 = vpop.f32.mrb[21].mxu0  ;;  %v584_v17 = vpop.f32.mrb[21].mxu1 }
 0x11f   :  { %v809_v14 = vsel %vm681_vm1, %v577_v60, %v745_v4  ;;  %vm679_vm3 = vcmp.ge.f32.partialorder %v569_v6, 0.0  ;;  %v743_v18 = vmul.f32 0.2, %v569_v6  ;;  %vm650_vm4 = vcmp.ge.f32.partialorder %v452_v9, 0.0  ;;  %v1586_v23 = vpop.f32.mrb[22].mxu0  ;;  %v1618_v24 = vpop.f32.mrb[22].mxu1 }
 0x120   :  { %v714_v19 = vmul.f32 0.2, %v452_v9  ;;  %1497 = vst [vmem:[%s2000_s3 + $0xb0] sm:$0xff] %v1429_v13   ;;  %v775_v20 = vsel %vm647_vm2, %v441_v5, %v711_v15  ;;  %vm682_vm5 = vcmp.ge.f32.partialorder %v580_v10, 0.0  ;;  %v746_v21 = vmul.f32 0.2, %v580_v10 }
 0x121   :  { %v444_v22 = vadd.f32 %v1826_v40, %v443_v56  ;;  %v807_v25 = vsel %vm679_vm3, %v569_v6, %v743_v18  ;;  %v572_v27 = vadd.f32 %v1826_v40, %v571_v61  ;;  %v465_v28 = vadd.f32 %v1585_v11, %v1826_v40  ;;  %v459_v29 = vpop.f32.mrb[23].mxu0  ;;  %v587_v30 = vpop.f32.mrb[23].mxu1 }
 0x122   :  { %v778_v26 = vsel %vm650_vm4, %v452_v9, %v714_v19  ;;  %v810_v32 = vsel %vm682_vm5, %v580_v10, %v746_v21  ;;  %v593_v38 = vadd.f32 %v1617_v12, %v1826_v40  ;;  %v457_v39 = vadd.f32 %v1826_v40, %v456_v16 }
 0x123   :  { %v1364_v31 = vpack.c.bf16 %v778_v26, %v777_v8  ;;  %vm648_vm6 = vcmp.ge.f32.partialorder %v444_v22, 0.0  ;;  %v712_v33 = vmul.f32 0.2, %v444_v22  ;;  %v1444_v34 = vpack.c.bf16 %v810_v32, %v809_v14 }
 0x124   :  { %vm680_vm7 = vcmp.ge.f32.partialorder %v572_v27, 0.0  ;;  %v744_v35 = vmul.f32 0.2, %v572_v27  ;;  %vm653_vm8 = vcmp.ge.f32.partialorder %v465_v28, 0.0  ;;  %v717_v37 = vmul.f32 0.2, %v465_v28 }
 0x125   :  { %1484 = vst [vmem:[%s2000_s3 + $0x48] sm:$0xff] %v1364_v31   ;;  %v776_v36 = vsel %vm648_vm6, %v444_v22, %v712_v33  ;;  %1500 = vst [vmem:[%s2000_s3 + $0xc8] sm:$0xff] %v1444_v34   ;;  %v585_v43 = vadd.f32 %v1826_v40, %v584_v17  ;;  %v468_v44 = vadd.f32 %v1586_v23, %v1826_v40  ;;  %v1589_v45 = vpop.f32.mrb[24].mxu0  ;;  %v1621_v46 = vpop.f32.mrb[24].mxu1  ;;  %vm685_vm9 = vcmp.ge.f32.partialorder %v593_v38, 0.0 }
 0x126   :  { %v1359_v41 = vpack.c.bf16 %v776_v36, %v775_v20  ;;  %v808_v42 = vsel %vm680_vm7, %v572_v27, %v744_v35  ;;  %v749_v48 = vmul.f32 0.2, %v593_v38  ;;  %v472_v49 = vpop.f32.mrb[25].mxu0  ;;  %v600_v50 = vpop.f32.mrb[25].mxu1  ;;  %v781_v51 = vsel %vm653_vm8, %v465_v28, %v717_v37 }
 0x127   :  { %v1439_v47 = vpack.c.bf16 %v808_v42, %v807_v25  ;;  %vm651_vm10 = vcmp.ge.f32.partialorder %v457_v39, 0.0  ;;  %v715_v52 = vmul.f32 0.2, %v457_v39  ;;  %v747_v53 = vmul.f32 0.2, %v585_v43  ;;  %v1590_v56 = vpop.f32.mrb[26].mxu0 }
 0x128   :  { %1483 = vst [vmem:[%s2000_s3 + $0x40] sm:$0xff] %v1359_v41   ;;  %vm683_vm11 = vcmp.ge.f32.partialorder %v585_v43, 0.0  ;;  %vm654_vm12 = vcmp.ge.f32.partialorder %v468_v44, 0.0  ;;  %v718_v54 = vmul.f32 0.2, %v468_v44  ;;  %v596_v55 = vadd.f32 %v1618_v24, %v1826_v40  ;;  %v1622_v57 = vpop.f32.mrb[26].mxu1 }
 0x129   :  { %1499 = vst [vmem:[%s2000_s3 + $0xc0] sm:$0xff] %v1439_v47   ;;  %v813_v58 = vsel %vm685_vm9, %v593_v38, %v749_v48  ;;  %v779_v59 = vsel %vm651_vm10, %v457_v39, %v715_v52  ;;  %v460_v60 = vadd.f32 %v1826_v40, %v459_v29  ;;  %v588_v61 = vadd.f32 %v1826_v40, %v587_v30  ;;  %v475_v62 = vpop.f32.mrb[27].mxu0  ;;  %v603_v63 = vpop.f32.mrb[27].mxu1 }
 0x12a   :  { %v782_v0 = vsel %vm654_vm12, %v468_v44, %v718_v54  ;;  %vm686_vm13 = vcmp.ge.f32.partialorder %v596_v55, 0.0  ;;  %v750_v1 = vmul.f32 0.2, %v596_v55  ;;  %v481_v2 = vadd.f32 %v1589_v45, %v1826_v40 }
 0x12b   :  { %v1374_v3 = vpack.c.bf16 %v782_v0, %v781_v51  ;;  %vm652_vm14 = vcmp.ge.f32.partialorder %v460_v60, 0.0  ;;  %v716_v4 = vmul.f32 0.2, %v460_v60  ;;  %vm684_vm15 = vcmp.ge.f32.partialorder %v588_v61, 0.0 }
 0x12c   :  { %v814_v5 = vsel %vm686_vm13, %v596_v55, %v750_v1  ;;  %v748_v6 = vmul.f32 0.2, %v588_v61  ;;  %vm657_vm0 = vcmp.ge.f32.partialorder %v481_v2, 0.0  ;;  %v721_v7 = vmul.f32 0.2, %v481_v2 }
 0x12d   :  { %1486 = vst [vmem:[%s2000_s3 + $0x58] sm:$0xff] %v1374_v3   ;;  %v1454_v8 = vpack.c.bf16 %v814_v5, %v813_v58  ;;  %v780_v9 = vsel %vm652_vm14, %v460_v60, %v716_v4  ;;  %v609_v10 = vadd.f32 %v1621_v46, %v1826_v40  ;;  %v473_v11 = vadd.f32 %v1826_v40, %v472_v49  ;;  %v1593_v12 = vpop.f32.mrb[28].mxu0  ;;  %v1625_v13 = vpop.f32.mrb[28].mxu1 }
 0x12e   :  { %v811_v14 = vsel %vm683_vm11, %v585_v43, %v747_v53  ;;  %v1369_v15 = vpack.c.bf16 %v780_v9, %v779_v59  ;;  %v812_v16 = vsel %vm684_vm15, %v588_v61, %v748_v6  ;;  %v601_v17 = vadd.f32 %v1826_v40, %v600_v50  ;;  %v488_v18 = vpop.f32.mrb[29].mxu0  ;;  %v616_v19 = vpop.f32.mrb[29].mxu1 }
 0x12f   :  { %1502 = vst [vmem:[%s2000_s3 + $0xd8] sm:$0xff] %v1454_v8   ;;  %v1449_v20 = vpack.c.bf16 %v812_v16, %v811_v14  ;;  %vm689_vm1 = vcmp.ge.f32.partialorder %v609_v10, 0.0  ;;  %v753_v21 = vmul.f32 0.2, %v609_v10  ;;  %vm655_vm2 = vcmp.ge.f32.partialorder %v473_v11, 0.0  ;;  %v1594_v22 = vpop.f32.mrb[30].mxu0 }
 0x130   :  { %v1626_v23 = vpop.f32.mrb[30].mxu1  ;;  %1485 = vst [vmem:[%s2000_s3 + $0x50] sm:$0xff] %v1369_v15   ;;  %v785_v24 = vsel %vm657_vm0, %v481_v2, %v721_v7  ;;  %v719_v25 = vmul.f32 0.2, %v473_v11  ;;  %vm687_vm3 = vcmp.ge.f32.partialorder %v601_v17, 0.0  ;;  %v484_v26 = vadd.f32 %v1590_v56, %v1826_v40  ;;  %v491_v27 = vpop.f32.mrb[31].mxu0 }
 0x131   :  { %1501 = vst [vmem:[%s2000_s3 + $0xd0] sm:$0xff] %v1449_v20   ;;  %v751_v28 = vmul.f32 0.2, %v601_v17  ;;  %v612_v29 = vadd.f32 %v1622_v57, %v1826_v40  ;;  %v476_v30 = vadd.f32 %v1826_v40, %v475_v62  ;;  %v604_v31 = vadd.f32 %v1826_v40, %v603_v63  ;;  %v619_v32 = vpop.f32.mrb[31].mxu1 }
 0x132   :  { %v817_v33 = vsel %vm689_vm1, %v609_v10, %v753_v21  ;;  %v783_v34 = vsel %vm655_vm2, %v473_v11, %v719_v25  ;;  %vm658_vm4 = vcmp.ge.f32.partialorder %v484_v26, 0.0  ;;  %v722_v35 = vmul.f32 0.2, %v484_v26 }
 0x133   :  { %vm690_vm5 = vcmp.ge.f32.partialorder %v612_v29, 0.0  ;;  %v754_v36 = vmul.f32 0.2, %v612_v29  ;;  %vm656_vm6 = vcmp.ge.f32.partialorder %v476_v30, 0.0  ;;  %v720_v37 = vmul.f32 0.2, %v476_v30 }
 0x134   :  { %v786_v38 = vsel %vm658_vm4, %v484_v26, %v722_v35  ;;  %vm688_vm7 = vcmp.ge.f32.partialorder %v604_v31, 0.0  ;;  %v752_v39 = vmul.f32 0.2, %v604_v31  ;;  %v497_v41 = vadd.f32 %v1593_v12, %v1826_v40 }
 0x135   :  { %v1384_v42 = vpack.c.bf16 %v786_v38, %v785_v24  ;;  %v818_v43 = vsel %vm690_vm5, %v612_v29, %v754_v36  ;;  %v784_v44 = vsel %vm656_vm6, %v476_v30, %v720_v37  ;;  %v625_v45 = vadd.f32 %v1625_v13, %v1826_v40 }
 0x136   :  { %v815_v46 = vsel %vm687_vm3, %v601_v17, %v751_v28  ;;  %v1464_v47 = vpack.c.bf16 %v818_v43, %v817_v33  ;;  %v1379_v48 = vpack.c.bf16 %v784_v44, %v783_v34  ;;  %v816_v49 = vsel %vm688_vm7, %v604_v31, %v752_v39 }
 0x137   :  { %1488 = vst [vmem:[%s2000_s3 + $0x68] sm:$0xff] %v1384_v42   ;;  %v1459_v50 = vpack.c.bf16 %v816_v49, %v815_v46  ;;  %vm661_vm8 = vcmp.ge.f32.partialorder %v497_v41, 0.0  ;;  %v725_v51 = vmul.f32 0.2, %v497_v41  ;;  %v757_v52 = vmul.f32 0.2, %v625_v45 }
 0x138   :  { %1504 = vst [vmem:[%s2000_s3 + $0xe8] sm:$0xff] %v1464_v47   ;;  %1487 = vst [vmem:[%s2000_s3 + $0x60] sm:$0xff] %v1379_v48   ;;  %v489_v53 = vadd.f32 %v1826_v40, %v488_v18  ;;  %v617_v54 = vadd.f32 %v1826_v40, %v616_v19  ;;  %v500_v55 = vadd.f32 %v1594_v22, %v1826_v40  ;;  %vm693_vm9 = vcmp.ge.f32.partialorder %v625_v45, 0.0 }
 0x139   :  { %v628_v56 = vadd.f32 %v1626_v23, %v1826_v40  ;;  %1503 = vst [vmem:[%s2000_s3 + $0xe0] sm:$0xff] %v1459_v50   ;;  %v492_v57 = vadd.f32 %v1826_v40, %v491_v27  ;;  %v620_v58 = vadd.f32 %v1826_v40, %v619_v32  ;;  %v789_v59 = vsel %vm661_vm8, %v497_v41, %v725_v51 }
 0x13a   :  { %vm659_vm10 = vcmp.ge.f32.partialorder %v489_v53, 0.0  ;;  %v723_v60 = vmul.f32 0.2, %v489_v53  ;;  %v755_v61 = vmul.f32 0.2, %v617_v54  ;;  %vm662_vm11 = vcmp.ge.f32.partialorder %v500_v55, 0.0 }
 0x13b   :  { %v726_v62 = vmul.f32 0.2, %v500_v55  ;;  %vm694_vm12 = vcmp.ge.f32.partialorder %v628_v56, 0.0  ;;  %v758_v63 = vmul.f32 0.2, %v628_v56  ;;  %v821_v0 = vsel %vm693_vm9, %v625_v45, %v757_v52 }
 0x13c   :  { %vm691_vm13 = vcmp.ge.f32.partialorder %v617_v54, 0.0  ;;  %vm660_vm14 = vcmp.ge.f32.partialorder %v492_v57, 0.0  ;;  %v724_v1 = vmul.f32 0.2, %v492_v57  ;;  %vm692_vm15 = vcmp.ge.f32.partialorder %v620_v58, 0.0 }
 0x13d   :  { %v790_v2 = vsel %vm662_vm11, %v500_v55, %v726_v62  ;;  %v822_v3 = vsel %vm694_vm12, %v628_v56, %v758_v63  ;;  %v756_v4 = vmul.f32 0.2, %v620_v58  ;;  %v787_v5 = vsel %vm659_vm10, %v489_v53, %v723_v60 }
 0x13e   :  { %v1394_v6 = vpack.c.bf16 %v790_v2, %v789_v59  ;;  %v1474_v7 = vpack.c.bf16 %v822_v3, %v821_v0  ;;  %v788_v40 = vsel %vm660_vm14, %v492_v57, %v724_v1  ;;  %v819_v8 = vsel %vm691_vm13, %v617_v54, %v755_v61 }
 0x13f   :  { %v1389_v9 = vpack.c.bf16 %v788_v40, %v787_v5  ;;  %v820_v10 = vsel %vm692_vm15, %v620_v58, %v756_v4 }
 0x140   :  { %1490 = vst [vmem:[%s2000_s3 + $0x78] sm:$0xff] %v1394_v6   ;;  %1506 = vst [vmem:[%s2000_s3 + $0xf8] sm:$0xff] %v1474_v7   ;;  %v1469_v11 = vpack.c.bf16 %v820_v10, %v819_v8 }
 0x141   :  { %1489 = vst [vmem:[%s2000_s3 + $0x70] sm:$0xff] %v1389_v9  }
 0x142   :  { %1505 = vst [vmem:[%s2000_s3 + $0xf0] sm:$0xff] %v1469_v11  }

// kernel: patch_discriminator1_forward.8
= control target key start
LH: loop header
LB: loop body
LE: loop exit
PB: predicated region body
PF: predicated region fallthrough
CT: control target
= control target key end

     0   :  { %s868_s1 = inlined_call_operand.vmem [shape: bf16[256,128], index: 1, kind: input, shape index: {}]   ;;  %s869_s0 = inlined_call_operand.vmem [shape: bf16[128,256], index: 0, kind: input, shape index: {}]   ;;  %s870_s2 = inlined_call_operand.vmem [shape: f32[1,128], index: 2, kind: input, shape index: {}]   ;;  %s871_s3 = inlined_call_operand.vmem [shape: bf16[128,128], index: 3, kind: output, shape index: {}]  }
   0x1   :  { %v667_v0 = vld [vmem:[%s868_s1 + $0x40] sm:$0xff]   ;;  %v669_v2 = vld [vmem:[%s868_s1 + $0x48] sm:$0xff]   ;;  %v671_v4 = vld [vmem:[%s868_s1 + $0x50] sm:$0xff]  }
   0x2   :  { %v668_v1 = vld [vmem:[%s868_s1] sm:$0xff]   ;;  %587 = vmatprep.subr.bf16.mxu0 %v667_v0  ;;  %651 = vmatprep.subr.bf16.mxu1 %v667_v0  ;;  %v670_v3 = vld [vmem:[%s868_s1 + $0x8] sm:$0xff]   ;;  %v672_v5 = vld [vmem:[%s868_s1 + $0x10] sm:$0xff]  }
   0x3   :  { %588 = vmatpush3.bf16.msra.mxu0 %v668_v1  ;;  %659 = vmatpush3.bf16.msra.mxu1 %v668_v1  ;;  %v673_v6 = vld [vmem:[%s868_s1 + $0x58] sm:$0xff]   ;;  %v675_v8 = vld [vmem:[%s868_s1 + $0x60] sm:$0xff]   ;;  %v677_v10 = vld [vmem:[%s868_s1 + $0x68] sm:$0xff]  }
   0x4   :  { %589 = vmatprep.subr.bf16.mxu0 %v669_v2  ;;  %652 = vmatprep.subr.bf16.mxu1 %v669_v2  ;;  %v674_v7 = vld [vmem:[%s868_s1 + $0x18] sm:$0xff]   ;;  %v676_v9 = vld [vmem:[%s868_s1 + $0x20] sm:$0xff]   ;;  %v678_v13 = vld [vmem:[%s868_s1 + $0x28] sm:$0xff]  }
   0x5   :  { %v685_v11 = vld [vmem:[%s869_s0 + $0x4] ss:$8 sps:$4 sm:$0xff]   ;;  %v679_v14 = vld [vmem:[%s868_s1 + $0x70] sm:$0xff]   ;;  %v681_v16 = vld [vmem:[%s868_s1 + $0x78] sm:$0xff]  }
   0x6   :  { %v688_v12 = vld [vmem:[%s869_s0 + $0x44] ss:$8 sps:$4 sm:$0xff]   ;;  %278 = vmatprep.mubr.bf16.mxu0 %v685_v11  ;;  %v680_v15 = vld [vmem:[%s868_s1 + $0x30] sm:$0xff]   ;;  %v682_v17 = vld [vmem:[%s868_s1 + $0x38] sm:$0xff]  }
   0x7   :  { %590 = vmatpush3.bf16.msra.mxu0 %v670_v3  ;;  %660 = vmatpush3.bf16.msra.mxu1 %v670_v3  ;;  %v683_v18 = vld [vmem:[%s869_s0] ss:$8 sps:$4 sm:$0xff]   ;;  %v689_v20 = vld [vmem:[%s869_s0 + $0x14] ss:$8 sps:$4 sm:$0xff]   ;;  %v693_v22 = vld [vmem:[%s869_s0 + $0x10] ss:$8 sps:$4 sm:$0xff]  }
   0x8   :  { %591 = vmatprep.subr.bf16.mxu0 %v671_v4  ;;  %653 = vmatprep.subr.bf16.mxu1 %v671_v4  ;;  %v686_v19 = vld [vmem:[%s869_s0 + $0x40] ss:$8 sps:$4 sm:$0xff]   ;;  %v691_v21 = vld [vmem:[%s869_s0 + $0x54] ss:$8 sps:$4 sm:$0xff]   ;;  %v694_v23 = vld [vmem:[%s869_s0 + $0x50] ss:$8 sps:$4 sm:$0xff]  }
   0x9   :  { %310 = vmatprep.mubr.bf16.mxu1 %v688_v12  ;;  %v695_v24 = vld [vmem:[%s869_s0 + $0x24] ss:$8 sps:$4 sm:$0xff]   ;;  %v699_v26 = vld [vmem:[%s869_s0 + $0x20] ss:$8 sps:$4 sm:$0xff]   ;;  %v701_v28 = vld [vmem:[%s869_s0 + $0x34] ss:$8 sps:$4 sm:$0xff]  }
   0xa   :  { %v697_v25 = vld [vmem:[%s869_s0 + $0x64] ss:$8 sps:$4 sm:$0xff]   ;;  %v700_v27 = vld [vmem:[%s869_s0 + $0x60] ss:$8 sps:$4 sm:$0xff]   ;;  %v703_v29 = vld [vmem:[%s869_s0 + $0x74] ss:$8 sps:$4 sm:$0xff]  }
   0xb   :  { %592 = vmatpush3.bf16.msra.mxu0 %v672_v5  ;;  %661 = vmatpush3.bf16.msra.mxu1 %v672_v5  ;;  %v705_v30 = vld [vmem:[%s869_s0 + $0x30] ss:$8 sps:$4 sm:$0xff]   ;;  %v826_v34 = vld [vmem:[%s870_s2] ss:$0 sm:$0xff] }
   0xc   :  { %593 = vmatprep.subr.bf16.mxu0 %v673_v6  ;;  %654 = vmatprep.subr.bf16.mxu1 %v673_v6  ;;  %v706_v31 = vld [vmem:[%s869_s0 + $0x70] ss:$8 sps:$4 sm:$0xff]  }
   0xf   :  { %594 = vmatpush3.bf16.msra.mxu0 %v674_v7  ;;  %662 = vmatpush3.bf16.msra.mxu1 %v674_v7 }
  0x10   :  { %595 = vmatprep.subr.bf16.mxu0 %v675_v8  ;;  %655 = vmatprep.subr.bf16.mxu1 %v675_v8 }
  0x13   :  { %596 = vmatpush3.bf16.msra.mxu0 %v676_v9  ;;  %663 = vmatpush3.bf16.msra.mxu1 %v676_v9 }
  0x14   :  { %597 = vmatprep.subr.bf16.mxu0 %v677_v10  ;;  %656 = vmatprep.subr.bf16.mxu1 %v677_v10 }
  0x17   :  { %598 = vmatpush3.bf16.msra.mxu0 %v678_v13  ;;  %664 = vmatpush3.bf16.msra.mxu1 %v678_v13 }
  0x18   :  { %599 = vmatprep.subr.bf16.mxu0 %v679_v14  ;;  %657 = vmatprep.subr.bf16.mxu1 %v679_v14 }
  0x1b   :  { %600 = vmatpush3.bf16.msra.mxu0 %v680_v15  ;;  %665 = vmatpush3.bf16.msra.mxu1 %v680_v15 }
  0x1c   :  { %601 = vmatprep.subr.bf16.mxu0 %v681_v16  ;;  %658 = vmatprep.subr.bf16.mxu1 %v681_v16 }
  0x1f   :  { %602 = vmatpush3.bf16.msra.mxu0 %v682_v17  ;;  %666 = vmatpush3.bf16.msra.mxu1 %v682_v17 }
  0x22   :  { %279 = vmatmul.mubr.bf16.vlgmr.msra.gmra.mrb[0].mxu0 %v683_v18  ;;  %311 = vmatmul.mubr.bf16.vlgmr.msra.gmra.mrb[0].mxu1 %v686_v19 }
  0x23   :  { %286 = vmatprep.mubr.bf16.mxu0 %v689_v20  ;;  %318 = vmatprep.mubr.bf16.mxu1 %v691_v21 }
  0x2a   :  { %287 = vmatmul.mubr.bf16.gmra.mrb[4].mxu0 %v693_v22  ;;  %319 = vmatmul.mubr.bf16.gmra.mrb[4].mxu1 %v694_v23 }
  0x2b   :  { %294 = vmatprep.mubr.bf16.mxu0 %v695_v24  ;;  %326 = vmatprep.mubr.bf16.mxu1 %v697_v25 }
  0x32   :  { %295 = vmatmul.mubr.bf16.gmra.mrb[8].mxu0 %v699_v26  ;;  %327 = vmatmul.mubr.bf16.gmra.mrb[8].mxu1 %v700_v27 }
  0x33   :  { %302 = vmatprep.mubr.bf16.mxu0 %v701_v28  ;;  %334 = vmatprep.mubr.bf16.mxu1 %v703_v29 }
  0x3a   :  { %303 = vmatmul.mubr.bf16.gmra.mrb[12].mxu0 %v705_v30  ;;  %335 = vmatmul.mubr.bf16.gmra.mrb[12].mxu1 %v706_v31 }
  0xf5   :  { %v603_v32 = vpop.f32.mrb[0].mxu0  ;;  %v627_v33 = vpop.f32.mrb[0].mxu1 }
  0xf6   :  { %v604_v35 = vpop.f32.mrb[1].mxu0  ;;  %v628_v36 = vpop.f32.mrb[1].mxu1 }
  0xf7   :  { %v605_v37 = vadd.f32 %v604_v35, %v603_v32  ;;  %v629_v38 = vadd.f32 %v628_v36, %v627_v33  ;;  %v606_v39 = vpop.f32.mrb[2].mxu0  ;;  %v630_v40 = vpop.f32.mrb[2].mxu1 }
  0xf8   :  { %v607_v41 = vpop.f32.mrb[3].mxu0  ;;  %v631_v42 = vpop.f32.mrb[3].mxu1 }
  0xf9   :  { %v281_v43 = vadd.f32 %v605_v37, %v826_v34  ;;  %v313_v44 = vadd.f32 %v629_v38, %v826_v34  ;;  %v608_v45 = vadd.f32 %v607_v41, %v606_v39  ;;  %v632_v46 = vadd.f32 %v631_v42, %v630_v40 }
  0xfb   :  { %v359_v47 = vmul.f32 0.2, %v281_v43  ;;  %v367_v48 = vmul.f32 0.2, %v313_v44  ;;  %vm343_vm0 = vcmp.ge.f32.partialorder %v281_v43, 0.0  ;;  %vm351_vm1 = vcmp.ge.f32.partialorder %v313_v44, 0.0 }
  0xfc   :  { %v284_v49 = vadd.f32 %v608_v45, %v826_v34  ;;  %v316_v50 = vadd.f32 %v632_v46, %v826_v34 }
  0xfd   :  { %v609_v51 = vpop.f32.mrb[4].mxu0  ;;  %v633_v52 = vpop.f32.mrb[4].mxu1  ;;  %v375_v55 = vsel %vm343_vm0, %v281_v43, %v359_v47  ;;  %v383_v56 = vsel %vm351_vm1, %v313_v44, %v367_v48 }
  0xfe   :  { %vm344_vm2 = vcmp.ge.f32.partialorder %v284_v49, 0.0  ;;  %v360_v53 = vmul.f32 0.2, %v284_v49  ;;  %vm352_vm3 = vcmp.ge.f32.partialorder %v316_v50, 0.0  ;;  %v368_v54 = vmul.f32 0.2, %v316_v50 }
  0xff   :  { %v610_v57 = vpop.f32.mrb[5].mxu0  ;;  %v634_v58 = vpop.f32.mrb[5].mxu1 }
 0x100   :  { %v376_v59 = vsel %vm344_vm2, %v284_v49, %v360_v53  ;;  %v384_v60 = vsel %vm352_vm3, %v316_v50, %v368_v54  ;;  %v611_v61 = vadd.f32 %v610_v57, %v609_v51  ;;  %v635_v62 = vadd.f32 %v634_v58, %v633_v52  ;;  %v612_v63 = vpop.f32.mrb[6].mxu0  ;;  %v636_v0 = vpop.f32.mrb[6].mxu1 }
 0x101   :  { %v543_v1 = vpack.c.bf16 %v376_v59, %v375_v55  ;;  %v563_v2 = vpack.c.bf16 %v384_v60, %v383_v56  ;;  %v613_v3 = vpop.f32.mrb[7].mxu0  ;;  %v637_v4 = vpop.f32.mrb[7].mxu1 }
 0x102   :  { %v289_v5 = vadd.f32 %v611_v61, %v826_v34  ;;  %v321_v6 = vadd.f32 %v635_v62, %v826_v34  ;;  %v614_v7 = vadd.f32 %v613_v3, %v612_v63  ;;  %v638_v8 = vadd.f32 %v637_v4, %v636_v0 }
 0x103   :  { %544 = vst [vmem:[%s871_s3] sm:$0xff] %v543_v1   ;;  %583 = vst [vmem:[%s871_s3 + $0x20] sm:$0xff] %v563_v2  }
 0x104   :  { %v361_v9 = vmul.f32 0.2, %v289_v5  ;;  %v369_v10 = vmul.f32 0.2, %v321_v6  ;;  %v292_v11 = vadd.f32 %v614_v7, %v826_v34  ;;  %v324_v12 = vadd.f32 %v638_v8, %v826_v34 }
 0x105   :  { %v615_v13 = vpop.f32.mrb[8].mxu0  ;;  %v639_v14 = vpop.f32.mrb[8].mxu1  ;;  %vm345_vm4 = vcmp.ge.f32.partialorder %v289_v5, 0.0  ;;  %vm353_vm5 = vcmp.ge.f32.partialorder %v321_v6, 0.0 }
 0x106   :  { %v616_v15 = vpop.f32.mrb[9].mxu0  ;;  %v640_v16 = vpop.f32.mrb[9].mxu1  ;;  %vm346_vm6 = vcmp.ge.f32.partialorder %v292_v11, 0.0  ;;  %v362_v17 = vmul.f32 0.2, %v292_v11  ;;  %vm354_vm7 = vcmp.ge.f32.partialorder %v324_v12, 0.0  ;;  %v377_v23 = vsel %vm345_vm4, %v289_v5, %v361_v9 }
 0x107   :  { %v370_v18 = vmul.f32 0.2, %v324_v12  ;;  %v617_v19 = vadd.f32 %v616_v15, %v615_v13  ;;  %v641_v20 = vadd.f32 %v640_v16, %v639_v14  ;;  %v618_v21 = vpop.f32.mrb[10].mxu0  ;;  %v642_v22 = vpop.f32.mrb[10].mxu1  ;;  %v385_v24 = vsel %vm353_vm5, %v321_v6, %v369_v10 }
 0x108   :  { %v378_v25 = vsel %vm346_vm6, %v292_v11, %v362_v17  ;;  %v619_v27 = vpop.f32.mrb[11].mxu0  ;;  %v643_v28 = vpop.f32.mrb[11].mxu1 }
 0x109   :  { %v386_v26 = vsel %vm354_vm7, %v324_v12, %v370_v18  ;;  %v548_v29 = vpack.c.bf16 %v378_v25, %v377_v23  ;;  %v297_v31 = vadd.f32 %v617_v19, %v826_v34  ;;  %v329_v32 = vadd.f32 %v641_v20, %v826_v34 }
 0x10a   :  { %v568_v30 = vpack.c.bf16 %v386_v26, %v385_v24  ;;  %v620_v33 = vadd.f32 %v619_v27, %v618_v21  ;;  %v644_v35 = vadd.f32 %v643_v28, %v642_v22 }
 0x10b   :  { %580 = vst [vmem:[%s871_s3 + $0x8] sm:$0xff] %v548_v29   ;;  %v363_v36 = vmul.f32 0.2, %v297_v31  ;;  %v371_v37 = vmul.f32 0.2, %v329_v32  ;;  %vm347_vm8 = vcmp.ge.f32.partialorder %v297_v31, 0.0 }
 0x10c   :  { %584 = vst [vmem:[%s871_s3 + $0x28] sm:$0xff] %v568_v30   ;;  %v300_v38 = vadd.f32 %v620_v33, %v826_v34  ;;  %v332_v39 = vadd.f32 %v644_v35, %v826_v34  ;;  %vm355_vm9 = vcmp.ge.f32.partialorder %v329_v32, 0.0 }
 0x10d   :  { %v621_v40 = vpop.f32.mrb[12].mxu0  ;;  %v645_v41 = vpop.f32.mrb[12].mxu1  ;;  %v379_v50 = vsel %vm347_vm8, %v297_v31, %v363_v36  ;;  %v387_v51 = vsel %vm355_vm9, %v329_v32, %v371_v37 }
 0x10e   :  { %v622_v42 = vpop.f32.mrb[13].mxu0  ;;  %v646_v43 = vpop.f32.mrb[13].mxu1  ;;  %vm348_vm10 = vcmp.ge.f32.partialorder %v300_v38, 0.0  ;;  %v364_v44 = vmul.f32 0.2, %v300_v38  ;;  %vm356_vm11 = vcmp.ge.f32.partialorder %v332_v39, 0.0 }
 0x10f   :  { %v372_v45 = vmul.f32 0.2, %v332_v39  ;;  %v623_v46 = vadd.f32 %v622_v42, %v621_v40  ;;  %v647_v47 = vadd.f32 %v646_v43, %v645_v41  ;;  %v624_v48 = vpop.f32.mrb[14].mxu0  ;;  %v648_v49 = vpop.f32.mrb[14].mxu1 }
 0x110   :  { %v380_v52 = vsel %vm348_vm10, %v300_v38, %v364_v44  ;;  %v625_v54 = vpop.f32.mrb[15].mxu0  ;;  %v649_v55 = vpop.f32.mrb[15].mxu1 }
 0x111   :  { %v388_v53 = vsel %vm356_vm11, %v332_v39, %v372_v45  ;;  %v553_v56 = vpack.c.bf16 %v380_v52, %v379_v50  ;;  %v305_v58 = vadd.f32 %v623_v46, %v826_v34  ;;  %v337_v59 = vadd.f32 %v647_v47, %v826_v34 }
 0x112   :  { %v573_v57 = vpack.c.bf16 %v388_v53, %v387_v51  ;;  %v626_v60 = vadd.f32 %v625_v54, %v624_v48  ;;  %v650_v61 = vadd.f32 %v649_v55, %v648_v49 }
 0x113   :  { %581 = vst [vmem:[%s871_s3 + $0x10] sm:$0xff] %v553_v56   ;;  %v365_v62 = vmul.f32 0.2, %v305_v58  ;;  %v373_v63 = vmul.f32 0.2, %v337_v59  ;;  %vm349_vm12 = vcmp.ge.f32.partialorder %v305_v58, 0.0 }
 0x114   :  { %585 = vst [vmem:[%s871_s3 + $0x30] sm:$0xff] %v573_v57   ;;  %v308_v0 = vadd.f32 %v626_v60, %v826_v34  ;;  %v340_v1 = vadd.f32 %v650_v61, %v826_v34  ;;  %vm357_vm13 = vcmp.ge.f32.partialorder %v337_v59, 0.0 }
 0x115   :  { %v381_v4 = vsel %vm349_vm12, %v305_v58, %v365_v62  ;;  %v389_v5 = vsel %vm357_vm13, %v337_v59, %v373_v63 }
 0x116   :  { %vm350_vm14 = vcmp.ge.f32.partialorder %v308_v0, 0.0  ;;  %v366_v2 = vmul.f32 0.2, %v308_v0  ;;  %vm358_vm15 = vcmp.ge.f32.partialorder %v340_v1, 0.0  ;;  %v374_v3 = vmul.f32 0.2, %v340_v1 }
 0x118   :  { %v382_v6 = vsel %vm350_vm14, %v308_v0, %v366_v2  ;;  %v390_v7 = vsel %vm358_vm15, %v340_v1, %v374_v3 }
 0x119   :  { %v558_v8 = vpack.c.bf16 %v382_v6, %v381_v4  ;;  %v578_v9 = vpack.c.bf16 %v390_v7, %v389_v5 }
 0x11b   :  { %582 = vst [vmem:[%s871_s3 + $0x18] sm:$0xff] %v558_v8   ;;  %586 = vst [vmem:[%s871_s3 + $0x38] sm:$0xff] %v578_v9  }

// kernel: patch_discriminator1_forward.9
= control target key start
LH: loop header
LB: loop body
LE: loop exit
PB: predicated region body
PF: predicated region fallthrough
CT: control target
= control target key end

     0   :  { %s769_s1 = inlined_call_operand.vmem [shape: bf16[512,128], index: 1, kind: input, shape index: {}]   ;;  %s770_s0 = inlined_call_operand.vmem [shape: bf16[32,512], index: 0, kind: input, shape index: {}]   ;;  %s771_s2 = inlined_call_operand.vmem [shape: f32[1,128], index: 2, kind: input, shape index: {}]   ;;  %s772_s3 = inlined_call_operand.vmem [shape: bf16[32,128], index: 3, kind: output, shape index: {}]  }
   0x1   :  { %v576_v0 = vld [vmem:[%s769_s1 + $0x40] sm:$0xff]   ;;  %v580_v4 = vld [vmem:[%s769_s1 + $0x48] sm:$0xff]   ;;  %v584_v8 = vld [vmem:[%s769_s1 + $0x50] sm:$0xff]  }
   0x2   :  { %v577_v1 = vld [vmem:[%s769_s1 + $0xc0] sm:$0xff]   ;;  %520 = vmatprep.subr.bf16.mxu0 %v576_v0  ;;  %v581_v5 = vld [vmem:[%s769_s1 + $0xc8] sm:$0xff]   ;;  %v585_v9 = vld [vmem:[%s769_s1 + $0xd0] sm:$0xff]  }
   0x3   :  { %v578_v2 = vld [vmem:[%s769_s1] sm:$0xff]   ;;  %548 = vmatprep.subr.bf16.mxu1 %v577_v1  ;;  %v582_v6 = vld [vmem:[%s769_s1 + $0x8] sm:$0xff]   ;;  %v586_v10 = vld [vmem:[%s769_s1 + $0x10] sm:$0xff]  }
   0x4   :  { %v579_v3 = vld [vmem:[%s769_s1 + $0x80] sm:$0xff]   ;;  %521 = vmatpush3.bf16.msra.mxu0 %v578_v2  ;;  %v583_v7 = vld [vmem:[%s769_s1 + $0x88] sm:$0xff]   ;;  %v587_v11 = vld [vmem:[%s769_s1 + $0x90] sm:$0xff]  }
   0x5   :  { %549 = vmatpush3.bf16.msra.mxu1 %v579_v3  ;;  %522 = vmatprep.subr.bf16.mxu0 %v580_v4  ;;  %v588_v12 = vld [vmem:[%s769_s1 + $0x58] sm:$0xff]   ;;  %v592_v16 = vld [vmem:[%s769_s1 + $0x60] sm:$0xff]   ;;  %v596_v20 = vld [vmem:[%s769_s1 + $0x68] sm:$0xff]  }
   0x6   :  { %550 = vmatprep.subr.bf16.mxu1 %v581_v5  ;;  %v589_v13 = vld [vmem:[%s769_s1 + $0xd8] sm:$0xff]   ;;  %v593_v17 = vld [vmem:[%s769_s1 + $0xe0] sm:$0xff]   ;;  %v597_v21 = vld [vmem:[%s769_s1 + $0xe8] sm:$0xff]  }
   0x7   :  { %v590_v14 = vld [vmem:[%s769_s1 + $0x18] sm:$0xff]   ;;  %v594_v18 = vld [vmem:[%s769_s1 + $0x20] sm:$0xff]   ;;  %v598_v22 = vld [vmem:[%s769_s1 + $0x28] sm:$0xff]  }
   0x8   :  { %523 = vmatpush3.bf16.msra.mxu0 %v582_v6  ;;  %v591_v15 = vld [vmem:[%s769_s1 + $0x98] sm:$0xff]   ;;  %v595_v19 = vld [vmem:[%s769_s1 + $0xa0] sm:$0xff]   ;;  %v599_v23 = vld [vmem:[%s769_s1 + $0xa8] sm:$0xff]  }
   0x9   :  { %551 = vmatpush3.bf16.msra.mxu1 %v583_v7  ;;  %524 = vmatprep.subr.bf16.mxu0 %v584_v8  ;;  %v600_v24 = vld [vmem:[%s769_s1 + $0x70] sm:$0xff]   ;;  %v604_v28 = vld [vmem:[%s769_s1 + $0x78] sm:$0xff]   ;;  %v460_v42 = vld [vmem:[%s771_s2] ss:$0 sm:$0xff] }
   0xa   :  { %552 = vmatprep.subr.bf16.mxu1 %v585_v9  ;;  %v601_v25 = vld [vmem:[%s769_s1 + $0xf0] sm:$0xff]   ;;  %v605_v29 = vld [vmem:[%s769_s1 + $0xf8] sm:$0xff]  }
   0xb   :  { %v602_v26 = vld [vmem:[%s769_s1 + $0x30] sm:$0xff]   ;;  %v606_v30 = vld [vmem:[%s769_s1 + $0x38] sm:$0xff]  }
   0xc   :  { %525 = vmatpush3.bf16.msra.mxu0 %v586_v10  ;;  %v603_v27 = vld [vmem:[%s769_s1 + $0xb0] sm:$0xff]   ;;  %v607_v31 = vld [vmem:[%s769_s1 + $0xb8] sm:$0xff]  }
   0xd   :  { %553 = vmatpush3.bf16.msra.mxu1 %v587_v11  ;;  %526 = vmatprep.subr.bf16.mxu0 %v588_v12  ;;  %v608_v32 = vld [vmem:[%s770_s0] ss:$16 sps:$4 sm:$0xff]   ;;  %v610_v33 = vld [vmem:[%s770_s0 + $0x4] ss:$16 sps:$4 sm:$0xff]   ;;  %v611_v34 = vld [vmem:[%s770_s0 + $0x8] ss:$16 sps:$4 sm:$0xff]  }
   0xe   :  { %554 = vmatprep.subr.bf16.mxu1 %v589_v13  ;;  %v613_v35 = vld [vmem:[%s770_s0 + $0xc] ss:$16 sps:$4 sm:$0xff]   ;;  %358 = vmatprep.mubr.bf16.mxu0 %v610_v33  ;;  %v614_v36 = vld [vmem:[%s770_s0 + $0x24] ss:$16 sps:$4 sm:$0xff]   ;;  %v618_v38 = vld [vmem:[%s770_s0 + $0x20] ss:$16 sps:$4 sm:$0xff]  }
   0xf   :  { %407 = vmatprep.mubr.bf16.mxu1 %v613_v35  ;;  %v616_v37 = vld [vmem:[%s770_s0 + $0x2c] ss:$16 sps:$4 sm:$0xff]   ;;  %v619_v39 = vld [vmem:[%s770_s0 + $0x28] ss:$16 sps:$4 sm:$0xff]  }
  0x10   :  { %527 = vmatpush3.bf16.msra.mxu0 %v590_v14 }
  0x11   :  { %555 = vmatpush3.bf16.msra.mxu1 %v591_v15  ;;  %528 = vmatprep.subr.bf16.mxu0 %v592_v16 }
  0x12   :  { %556 = vmatprep.subr.bf16.mxu1 %v593_v17 }
  0x14   :  { %529 = vmatpush3.bf16.msra.mxu0 %v594_v18 }
  0x15   :  { %557 = vmatpush3.bf16.msra.mxu1 %v595_v19  ;;  %530 = vmatprep.subr.bf16.mxu0 %v596_v20 }
  0x16   :  { %558 = vmatprep.subr.bf16.mxu1 %v597_v21 }
  0x18   :  { %531 = vmatpush3.bf16.msra.mxu0 %v598_v22 }
  0x19   :  { %559 = vmatpush3.bf16.msra.mxu1 %v599_v23  ;;  %532 = vmatprep.subr.bf16.mxu0 %v600_v24 }
  0x1a   :  { %560 = vmatprep.subr.bf16.mxu1 %v601_v25 }
  0x1c   :  { %533 = vmatpush3.bf16.msra.mxu0 %v602_v26 }
  0x1d   :  { %561 = vmatpush3.bf16.msra.mxu1 %v603_v27  ;;  %534 = vmatprep.subr.bf16.mxu0 %v604_v28 }
  0x1e   :  { %562 = vmatprep.subr.bf16.mxu1 %v605_v29 }
  0x20   :  { %535 = vmatpush3.bf16.msra.mxu0 %v606_v30 }
  0x21   :  { %563 = vmatpush3.bf16.msra.mxu1 %v607_v31 }
  0x23   :  { %359 = vmatmul.mubr.bf16.vlgmr.msra.gmra.mrb[0].mxu0 %v608_v32 }
  0x24   :  { %408 = vmatmul.mubr.bf16.vlgmr.msra.gmra.mrb[0].mxu1 %v611_v34  ;;  %366 = vmatprep.mubr.bf16.mxu0 %v614_v36 }
  0x25   :  { %415 = vmatprep.mubr.bf16.mxu1 %v616_v37 }
  0x2b   :  { %367 = vmatmul.mubr.bf16.gmra.mrb[4].mxu0 %v618_v38 }
  0x2c   :  { %416 = vmatmul.mubr.bf16.gmra.mrb[4].mxu1 %v619_v39 }
  0xf6   :  { %v536_v40 = vpop.f32.mrb[0].mxu0 }
  0xf7   :  { %v564_v41 = vpop.f32.mrb[0].mxu1  ;;  %v537_v43 = vpop.f32.mrb[1].mxu0 }
  0xf8   :  { %v538_v44 = vadd.f32 %v537_v43, %v536_v40  ;;  %v565_v45 = vpop.f32.mrb[1].mxu1  ;;  %v539_v46 = vpop.f32.mrb[2].mxu0 }
  0xf9   :  { %v566_v47 = vadd.f32 %v565_v45, %v564_v41  ;;  %v567_v48 = vpop.f32.mrb[2].mxu1  ;;  %v540_v49 = vpop.f32.mrb[3].mxu0 }
  0xfa   :  { %v361_v50 = vadd.f32 %v538_v44, %v460_v42  ;;  %v541_v51 = vadd.f32 %v540_v49, %v539_v46  ;;  %v568_v52 = vpop.f32.mrb[3].mxu1 }
  0xfb   :  { %v569_v53 = vadd.f32 %v568_v52, %v567_v48 }
  0xfc   :  { %v410_v54 = vadd.f32 %v566_v47, %v361_v50  ;;  %v364_v55 = vadd.f32 %v541_v51, %v460_v42 }
  0xfe   :  { %v428_v56 = vmul.f32 0.2, %v410_v54  ;;  %v413_v57 = vadd.f32 %v569_v53, %v364_v55  ;;  %v542_v58 = vpop.f32.mrb[4].mxu0  ;;  %vm424_vm0 = vcmp.ge.f32.partialorder %v410_v54, 0.0 }
  0xff   :  { %v570_v59 = vpop.f32.mrb[4].mxu1  ;;  %v543_v60 = vpop.f32.mrb[5].mxu0 }
 0x100   :  { %vm425_vm1 = vcmp.ge.f32.partialorder %v413_v57, 0.0  ;;  %v429_v61 = vmul.f32 0.2, %v413_v57  ;;  %v544_v62 = vadd.f32 %v543_v60, %v542_v58  ;;  %v571_v63 = vpop.f32.mrb[5].mxu1  ;;  %v545_v0 = vpop.f32.mrb[6].mxu0  ;;  %v432_v4 = vsel %vm424_vm0, %v410_v54, %v428_v56 }
 0x101   :  { %v572_v1 = vadd.f32 %v571_v63, %v570_v59  ;;  %v573_v2 = vpop.f32.mrb[6].mxu1  ;;  %v546_v3 = vpop.f32.mrb[7].mxu0 }
 0x102   :  { %v433_v5 = vsel %vm425_vm1, %v413_v57, %v429_v61  ;;  %v369_v6 = vadd.f32 %v544_v62, %v460_v42  ;;  %v547_v7 = vadd.f32 %v546_v3, %v545_v0  ;;  %v574_v8 = vpop.f32.mrb[7].mxu1 }
 0x103   :  { %v512_v9 = vpack.c.bf16 %v433_v5, %v432_v4  ;;  %v575_v10 = vadd.f32 %v574_v8, %v573_v2 }
 0x104   :  { %v418_v11 = vadd.f32 %v572_v1, %v369_v6  ;;  %v372_v12 = vadd.f32 %v547_v7, %v460_v42 }
 0x105   :  { %513 = vst [vmem:[%s772_s3] sm:$0xff] %v512_v9  }
 0x106   :  { %v430_v13 = vmul.f32 0.2, %v418_v11  ;;  %v421_v14 = vadd.f32 %v575_v10, %v372_v12  ;;  %vm426_vm2 = vcmp.ge.f32.partialorder %v418_v11, 0.0 }
 0x108   :  { %vm427_vm3 = vcmp.ge.f32.partialorder %v421_v14, 0.0  ;;  %v431_v15 = vmul.f32 0.2, %v421_v14  ;;  %v434_v16 = vsel %vm426_vm2, %v418_v11, %v430_v13 }
 0x10a   :  { %v435_v17 = vsel %vm427_vm3, %v421_v14, %v431_v15 }
 0x10b   :  { %v517_v18 = vpack.c.bf16 %v435_v17, %v434_v16 }
 0x10d   :  { %519 = vst [vmem:[%s772_s3 + $0x8] sm:$0xff] %v517_v18  }

// kernel: patch_discriminator1_forward.10
= control target key start
LH: loop header
LB: loop body
LE: loop exit
PB: predicated region body
PF: predicated region fallthrough
CT: control target
= control target key end

     0   :  { %s666_s1 = inlined_call_operand.vmem [shape: bf16[512,128], index: 1, kind: input, shape index: {}]   ;;  %s667_s0 = inlined_call_operand.vmem [shape: bf16[16,512], index: 0, kind: input, shape index: {}]   ;;  %s668_s2 = inlined_call_operand.vmem [shape: f32[1,128], index: 2, kind: input, shape index: {}]   ;;  %s669_s3 = inlined_call_operand.vmem [shape: bf16[16,128], index: 3, kind: output, shape index: {}]  }
   0x1   :  { %v494_v0 = vld [vmem:[%s666_s1 + $0x40] sm:$0xff]   ;;  %v498_v4 = vld [vmem:[%s666_s1 + $0x48] sm:$0xff]   ;;  %v502_v8 = vld [vmem:[%s666_s1 + $0x50] sm:$0xff]  }
   0x2   :  { %v495_v1 = vld [vmem:[%s666_s1 + $0xc0] sm:$0xff]   ;;  %450 = vmatprep.subr.bf16.mxu0 %v494_v0  ;;  %v499_v5 = vld [vmem:[%s666_s1 + $0xc8] sm:$0xff]   ;;  %v503_v9 = vld [vmem:[%s666_s1 + $0xd0] sm:$0xff]  }
   0x3   :  { %v496_v2 = vld [vmem:[%s666_s1] sm:$0xff]   ;;  %472 = vmatprep.subr.bf16.mxu1 %v495_v1  ;;  %v500_v6 = vld [vmem:[%s666_s1 + $0x8] sm:$0xff]   ;;  %v504_v10 = vld [vmem:[%s666_s1 + $0x10] sm:$0xff]  }
   0x4   :  { %v497_v3 = vld [vmem:[%s666_s1 + $0x80] sm:$0xff]   ;;  %451 = vmatpush3.bf16.msra.mxu0 %v496_v2  ;;  %v501_v7 = vld [vmem:[%s666_s1 + $0x88] sm:$0xff]   ;;  %v505_v11 = vld [vmem:[%s666_s1 + $0x90] sm:$0xff]  }
   0x5   :  { %473 = vmatpush3.bf16.msra.mxu1 %v497_v3  ;;  %452 = vmatprep.subr.bf16.mxu0 %v498_v4  ;;  %v506_v12 = vld [vmem:[%s666_s1 + $0x58] sm:$0xff]   ;;  %v510_v16 = vld [vmem:[%s666_s1 + $0x60] sm:$0xff]   ;;  %v514_v20 = vld [vmem:[%s666_s1 + $0x68] sm:$0xff]  }
   0x6   :  { %474 = vmatprep.subr.bf16.mxu1 %v499_v5  ;;  %v507_v13 = vld [vmem:[%s666_s1 + $0xd8] sm:$0xff]   ;;  %v511_v17 = vld [vmem:[%s666_s1 + $0xe0] sm:$0xff]   ;;  %v515_v21 = vld [vmem:[%s666_s1 + $0xe8] sm:$0xff]  }
   0x7   :  { %v508_v14 = vld [vmem:[%s666_s1 + $0x18] sm:$0xff]   ;;  %v512_v18 = vld [vmem:[%s666_s1 + $0x20] sm:$0xff]   ;;  %v516_v22 = vld [vmem:[%s666_s1 + $0x28] sm:$0xff]  }
   0x8   :  { %453 = vmatpush3.bf16.msra.mxu0 %v500_v6  ;;  %v509_v15 = vld [vmem:[%s666_s1 + $0x98] sm:$0xff]   ;;  %v513_v19 = vld [vmem:[%s666_s1 + $0xa0] sm:$0xff]   ;;  %v517_v23 = vld [vmem:[%s666_s1 + $0xa8] sm:$0xff]  }
   0x9   :  { %475 = vmatpush3.bf16.msra.mxu1 %v501_v7  ;;  %454 = vmatprep.subr.bf16.mxu0 %v502_v8  ;;  %v518_v24 = vld [vmem:[%s666_s1 + $0x70] sm:$0xff]   ;;  %v522_v28 = vld [vmem:[%s666_s1 + $0x78] sm:$0xff]   ;;  %v404_v38 = vld [vmem:[%s668_s2] ss:$0 sm:$0xff] }
   0xa   :  { %476 = vmatprep.subr.bf16.mxu1 %v503_v9  ;;  %v519_v25 = vld [vmem:[%s666_s1 + $0xf0] sm:$0xff]   ;;  %v523_v29 = vld [vmem:[%s666_s1 + $0xf8] sm:$0xff]  }
   0xb   :  { %v520_v26 = vld [vmem:[%s666_s1 + $0x30] sm:$0xff]   ;;  %v524_v30 = vld [vmem:[%s666_s1 + $0x38] sm:$0xff]  }
   0xc   :  { %455 = vmatpush3.bf16.msra.mxu0 %v504_v10  ;;  %v521_v27 = vld [vmem:[%s666_s1 + $0xb0] sm:$0xff]   ;;  %v525_v31 = vld [vmem:[%s666_s1 + $0xb8] sm:$0xff]  }
   0xd   :  { %477 = vmatpush3.bf16.msra.mxu1 %v505_v11  ;;  %456 = vmatprep.subr.bf16.mxu0 %v506_v12  ;;  %v526_v32 = vld [vmem:[%s667_s0] ss:$16 sps:$4 sm:$0xff]   ;;  %v528_v33 = vld [vmem:[%s667_s0 + $0x4] ss:$16 sps:$4 sm:$0xff]   ;;  %v529_v34 = vld [vmem:[%s667_s0 + $0x8] ss:$16 sps:$4 sm:$0xff]  }
   0xe   :  { %478 = vmatprep.subr.bf16.mxu1 %v507_v13  ;;  %v531_v35 = vld [vmem:[%s667_s0 + $0xc] ss:$16 sps:$4 sm:$0xff]   ;;  %334 = vmatprep.mubr.bf16.mxu0 %v528_v33 }
   0xf   :  { %375 = vmatprep.mubr.bf16.mxu1 %v531_v35 }
  0x10   :  { %457 = vmatpush3.bf16.msra.mxu0 %v508_v14 }
  0x11   :  { %479 = vmatpush3.bf16.msra.mxu1 %v509_v15  ;;  %458 = vmatprep.subr.bf16.mxu0 %v510_v16 }
  0x12   :  { %480 = vmatprep.subr.bf16.mxu1 %v511_v17 }
  0x14   :  { %459 = vmatpush3.bf16.msra.mxu0 %v512_v18 }
  0x15   :  { %481 = vmatpush3.bf16.msra.mxu1 %v513_v19  ;;  %460 = vmatprep.subr.bf16.mxu0 %v514_v20 }
  0x16   :  { %482 = vmatprep.subr.bf16.mxu1 %v515_v21 }
  0x18   :  { %461 = vmatpush3.bf16.msra.mxu0 %v516_v22 }
  0x19   :  { %483 = vmatpush3.bf16.msra.mxu1 %v517_v23  ;;  %462 = vmatprep.subr.bf16.mxu0 %v518_v24 }
  0x1a   :  { %484 = vmatprep.subr.bf16.mxu1 %v519_v25 }
  0x1c   :  { %463 = vmatpush3.bf16.msra.mxu0 %v520_v26 }
  0x1d   :  { %485 = vmatpush3.bf16.msra.mxu1 %v521_v27  ;;  %464 = vmatprep.subr.bf16.mxu0 %v522_v28 }
  0x1e   :  { %486 = vmatprep.subr.bf16.mxu1 %v523_v29 }
  0x20   :  { %465 = vmatpush3.bf16.msra.mxu0 %v524_v30 }
  0x21   :  { %487 = vmatpush3.bf16.msra.mxu1 %v525_v31 }
  0x23   :  { %335 = vmatmul.mubr.bf16.vlgmr.msra.gmra.mrb[0].mxu0 %v526_v32 }
  0x24   :  { %376 = vmatmul.mubr.bf16.vlgmr.msra.gmra.mrb[0].mxu1 %v529_v34 }
  0xf6   :  { %v466_v36 = vpop.f32.mrb[0].mxu0 }
  0xf7   :  { %v488_v37 = vpop.f32.mrb[0].mxu1  ;;  %v467_v39 = vpop.f32.mrb[1].mxu0 }
  0xf8   :  { %v468_v40 = vadd.f32 %v467_v39, %v466_v36  ;;  %v489_v41 = vpop.f32.mrb[1].mxu1  ;;  %v469_v42 = vpop.f32.mrb[2].mxu0 }
  0xf9   :  { %v490_v43 = vadd.f32 %v489_v41, %v488_v37  ;;  %v491_v44 = vpop.f32.mrb[2].mxu1  ;;  %v470_v45 = vpop.f32.mrb[3].mxu0 }
  0xfa   :  { %v337_v46 = vadd.f32 %v468_v40, %v404_v38  ;;  %v471_v47 = vadd.f32 %v470_v45, %v469_v42  ;;  %v492_v48 = vpop.f32.mrb[3].mxu1 }
  0xfb   :  { %v493_v49 = vadd.f32 %v492_v48, %v491_v44 }
  0xfc   :  { %v378_v50 = vadd.f32 %v490_v43, %v337_v46  ;;  %v340_v51 = vadd.f32 %v471_v47, %v404_v38 }
  0xfe   :  { %v386_v52 = vmul.f32 0.2, %v378_v50  ;;  %v381_v53 = vadd.f32 %v493_v49, %v340_v51  ;;  %vm384_vm0 = vcmp.ge.f32.partialorder %v378_v50, 0.0 }
 0x100   :  { %vm385_vm1 = vcmp.ge.f32.partialorder %v381_v53, 0.0  ;;  %v387_v54 = vmul.f32 0.2, %v381_v53  ;;  %v388_v55 = vsel %vm384_vm0, %v378_v50, %v386_v52 }
 0x102   :  { %v389_v56 = vsel %vm385_vm1, %v381_v53, %v387_v54 }
 0x103   :  { %v448_v57 = vpack.c.bf16 %v389_v56, %v388_v55 }
 0x105   :  { %449 = vst [vmem:[%s669_s3] sm:$0xff] %v448_v57  }

// kernel: patch_discriminator1_forward.11
= control target key start
LH: loop header
LB: loop body
LE: loop exit
PB: predicated region body
PF: predicated region fallthrough
CT: control target
= control target key end

     0   :  { %s652_s1 = inlined_call_operand.vmem [shape: bf16[512,128], index: 1, kind: input, shape index: {}]   ;;  %s653_s0 = inlined_call_operand.vmem [shape: bf16[16,512], index: 0, kind: input, shape index: {}]   ;;  %s654_s2 = inlined_call_operand.vmem [shape: f32[1,128], index: 2, kind: input, shape index: {}]   ;;  %s655_s3 = inlined_call_operand.vmem [shape: f32[16,128], index: 3, kind: output, shape index: {}]  }
   0x1   :  { %v477_v0 = vld [vmem:[%s652_s1 + $0x40] sm:$0xff]   ;;  %v481_v4 = vld [vmem:[%s652_s1 + $0x48] sm:$0xff]   ;;  %v485_v8 = vld [vmem:[%s652_s1 + $0x50] sm:$0xff]  }
   0x2   :  { %v478_v1 = vld [vmem:[%s652_s1 + $0xc0] sm:$0xff]   ;;  %433 = vmatprep.subr.bf16.mxu0 %v477_v0  ;;  %v482_v5 = vld [vmem:[%s652_s1 + $0xc8] sm:$0xff]   ;;  %v486_v9 = vld [vmem:[%s652_s1 + $0xd0] sm:$0xff]  }
   0x3   :  { %v479_v2 = vld [vmem:[%s652_s1] sm:$0xff]   ;;  %455 = vmatprep.subr.bf16.mxu1 %v478_v1  ;;  %v483_v6 = vld [vmem:[%s652_s1 + $0x8] sm:$0xff]   ;;  %v487_v10 = vld [vmem:[%s652_s1 + $0x10] sm:$0xff]  }
   0x4   :  { %v480_v3 = vld [vmem:[%s652_s1 + $0x80] sm:$0xff]   ;;  %434 = vmatpush3.bf16.msra.mxu0 %v479_v2  ;;  %v484_v7 = vld [vmem:[%s652_s1 + $0x88] sm:$0xff]   ;;  %v488_v11 = vld [vmem:[%s652_s1 + $0x90] sm:$0xff]  }
   0x5   :  { %456 = vmatpush3.bf16.msra.mxu1 %v480_v3  ;;  %435 = vmatprep.subr.bf16.mxu0 %v481_v4  ;;  %v489_v12 = vld [vmem:[%s652_s1 + $0x58] sm:$0xff]   ;;  %v493_v16 = vld [vmem:[%s652_s1 + $0x60] sm:$0xff]   ;;  %v497_v20 = vld [vmem:[%s652_s1 + $0x68] sm:$0xff]  }
   0x6   :  { %457 = vmatprep.subr.bf16.mxu1 %v482_v5  ;;  %v490_v13 = vld [vmem:[%s652_s1 + $0xd8] sm:$0xff]   ;;  %v494_v17 = vld [vmem:[%s652_s1 + $0xe0] sm:$0xff]   ;;  %v498_v21 = vld [vmem:[%s652_s1 + $0xe8] sm:$0xff]  }
   0x7   :  { %v491_v14 = vld [vmem:[%s652_s1 + $0x18] sm:$0xff]   ;;  %v495_v18 = vld [vmem:[%s652_s1 + $0x20] sm:$0xff]   ;;  %v499_v22 = vld [vmem:[%s652_s1 + $0x28] sm:$0xff]  }
   0x8   :  { %436 = vmatpush3.bf16.msra.mxu0 %v483_v6  ;;  %v492_v15 = vld [vmem:[%s652_s1 + $0x98] sm:$0xff]   ;;  %v496_v19 = vld [vmem:[%s652_s1 + $0xa0] sm:$0xff]   ;;  %v500_v23 = vld [vmem:[%s652_s1 + $0xa8] sm:$0xff]  }
   0x9   :  { %458 = vmatpush3.bf16.msra.mxu1 %v484_v7  ;;  %437 = vmatprep.subr.bf16.mxu0 %v485_v8  ;;  %v501_v24 = vld [vmem:[%s652_s1 + $0x70] sm:$0xff]   ;;  %v505_v28 = vld [vmem:[%s652_s1 + $0x78] sm:$0xff]   ;;  %v396_v38 = vld [vmem:[%s654_s2] ss:$0 sm:$0xff] }
   0xa   :  { %459 = vmatprep.subr.bf16.mxu1 %v486_v9  ;;  %v502_v25 = vld [vmem:[%s652_s1 + $0xf0] sm:$0xff]   ;;  %v506_v29 = vld [vmem:[%s652_s1 + $0xf8] sm:$0xff]  }
   0xb   :  { %v503_v26 = vld [vmem:[%s652_s1 + $0x30] sm:$0xff]   ;;  %v507_v30 = vld [vmem:[%s652_s1 + $0x38] sm:$0xff]  }
   0xc   :  { %438 = vmatpush3.bf16.msra.mxu0 %v487_v10  ;;  %v504_v27 = vld [vmem:[%s652_s1 + $0xb0] sm:$0xff]   ;;  %v508_v31 = vld [vmem:[%s652_s1 + $0xb8] sm:$0xff]  }
   0xd   :  { %460 = vmatpush3.bf16.msra.mxu1 %v488_v11  ;;  %439 = vmatprep.subr.bf16.mxu0 %v489_v12  ;;  %v509_v32 = vld [vmem:[%s653_s0] ss:$16 sps:$4 sm:$0xff]   ;;  %v511_v33 = vld [vmem:[%s653_s0 + $0x4] ss:$16 sps:$4 sm:$0xff]   ;;  %v512_v34 = vld [vmem:[%s653_s0 + $0x8] ss:$16 sps:$4 sm:$0xff]  }
   0xe   :  { %461 = vmatprep.subr.bf16.mxu1 %v490_v13  ;;  %v514_v35 = vld [vmem:[%s653_s0 + $0xc] ss:$16 sps:$4 sm:$0xff]   ;;  %334 = vmatprep.mubr.bf16.mxu0 %v511_v33 }
   0xf   :  { %375 = vmatprep.mubr.bf16.mxu1 %v514_v35 }
  0x10   :  { %440 = vmatpush3.bf16.msra.mxu0 %v491_v14 }
  0x11   :  { %462 = vmatpush3.bf16.msra.mxu1 %v492_v15  ;;  %441 = vmatprep.subr.bf16.mxu0 %v493_v16 }
  0x12   :  { %463 = vmatprep.subr.bf16.mxu1 %v494_v17 }
  0x14   :  { %442 = vmatpush3.bf16.msra.mxu0 %v495_v18 }
  0x15   :  { %464 = vmatpush3.bf16.msra.mxu1 %v496_v19  ;;  %443 = vmatprep.subr.bf16.mxu0 %v497_v20 }
  0x16   :  { %465 = vmatprep.subr.bf16.mxu1 %v498_v21 }
  0x18   :  { %444 = vmatpush3.bf16.msra.mxu0 %v499_v22 }
  0x19   :  { %466 = vmatpush3.bf16.msra.mxu1 %v500_v23  ;;  %445 = vmatprep.subr.bf16.mxu0 %v501_v24 }
  0x1a   :  { %467 = vmatprep.subr.bf16.mxu1 %v502_v25 }
  0x1c   :  { %446 = vmatpush3.bf16.msra.mxu0 %v503_v26 }
  0x1d   :  { %468 = vmatpush3.bf16.msra.mxu1 %v504_v27  ;;  %447 = vmatprep.subr.bf16.mxu0 %v505_v28 }
  0x1e   :  { %469 = vmatprep.subr.bf16.mxu1 %v506_v29 }
  0x20   :  { %448 = vmatpush3.bf16.msra.mxu0 %v507_v30 }
  0x21   :  { %470 = vmatpush3.bf16.msra.mxu1 %v508_v31 }
  0x23   :  { %335 = vmatmul.mubr.bf16.vlgmr.msra.gmra.mrb[0].mxu0 %v509_v32 }
  0x24   :  { %376 = vmatmul.mubr.bf16.vlgmr.msra.gmra.mrb[0].mxu1 %v512_v34 }
  0xf6   :  { %v449_v36 = vpop.f32.mrb[0].mxu0 }
  0xf7   :  { %v471_v37 = vpop.f32.mrb[0].mxu1  ;;  %v450_v39 = vpop.f32.mrb[1].mxu0 }
  0xf8   :  { %v451_v40 = vadd.f32 %v450_v39, %v449_v36  ;;  %v472_v41 = vpop.f32.mrb[1].mxu1  ;;  %v452_v42 = vpop.f32.mrb[2].mxu0 }
  0xf9   :  { %v473_v43 = vadd.f32 %v472_v41, %v471_v37  ;;  %v474_v44 = vpop.f32.mrb[2].mxu1  ;;  %v453_v45 = vpop.f32.mrb[3].mxu0 }
  0xfa   :  { %v337_v46 = vadd.f32 %v451_v40, %v396_v38  ;;  %v454_v47 = vadd.f32 %v453_v45, %v452_v42  ;;  %v475_v48 = vpop.f32.mrb[3].mxu1 }
  0xfb   :  { %v476_v49 = vadd.f32 %v475_v48, %v474_v44 }
  0xfc   :  { %v378_v50 = vadd.f32 %v473_v43, %v337_v46  ;;  %v340_v51 = vadd.f32 %v454_v47, %v396_v38 }
  0xfe   :  { %vm384_vm0 = vcmp.ge.f32.partialorder %v378_v50, 0.0  ;;  %v386_v52 = vmul.f32 0.2, %v378_v50  ;;  %v381_v53 = vadd.f32 %v476_v49, %v340_v51 }
 0x100   :  { %v388_v54 = vsel %vm384_vm0, %v378_v50, %v386_v52  ;;  %vm385_vm1 = vcmp.ge.f32.partialorder %v381_v53, 0.0  ;;  %v387_v55 = vmul.f32 0.2, %v381_v53 }
 0x101   :  { %390 = vst [vmem:[%s655_s3] sm:$0xff] %v388_v54 }
 0x102   :  { %v389_v56 = vsel %vm385_vm1, %v381_v53, %v387_v55 }
 0x103   :  { %391 = vst [vmem:[%s655_s3 + $0x8] sm:$0xff] %v389_v56 }

</bundles_post_ra>
